<compile_context>
chip_gen: v5e
topology: v5e:2x2
jax: 0.10.0
libtpu: 0.0.40
codegen_flags: <defaults>
</compile_context>

<pallas_src>
import jax
import jax.numpy as jnp
from jax import lax
from jax.experimental import pallas as pl
from jax.experimental.pallas import tpu as pltpu

# ----------------------------- configuration --------------------------------
B = 2                      # batch
C_IN, H, W = 4, 16, 16     # in_size
C1, C2 = 8, 8              # channels = [8, 8]
HID = 32                   # hidden_dims = [32]
OUT = 10                   # out_classes
KH = KW = 3                # Conv2d(kernel_size=3, padding=1)
HO, WO = H // 2, W // 2    # after the single 2x2 max-pool
HP, WP = H + 2, W + 2      # spatially padded extents (padding=1)


# ----------------------------- fused kernel ---------------------------------
def _cnn_kernel(xp_ref, w1_ref, b1_ref, w2_ref, b2_ref,
                wfc1_ref, bfc1_ref, wfc2_ref, bfc2_ref,
                out_ref, xp2_ref, a2_ref):
    f32 = jnp.float32

    # ---- Conv1 + bias + ReLU: 3 banded matmuls (one per kh) ----------------
    # operand: (B*H, WP*C_IN) = (32, 72); band weight: (72, WP*C1 = 144).
    # Output columns cover the padded width; border columns come out exactly 0
    # (zero weights + zero bias), which is conv2's left/right zero padding.
    a1 = b1_ref[...]                                   # (1, 144) bias seeds acc
    for kh in range(KH):
        rows = xp_ref[:, pl.ds(kh, H), :].reshape(B * H, WP * C_IN)
        a1 = a1 + jnp.dot(rows, w1_ref[kh], preferred_element_type=f32)
    a1 = jnp.maximum(a1, 0.0)                          # (32, 144)

    # ---- Assemble conv2's zero-padded input in VMEM ------------------------
    zrow = jnp.zeros((B, 1, WP * C1), f32)
    xp2_ref[:, pl.ds(0, 1), :] = zrow                  # top padding row
    xp2_ref[:, pl.ds(HP - 1, 1), :] = zrow             # bottom padding row
    xp2_ref[:, pl.ds(1, H), :] = a1.reshape(B, H, WP * C1)

    # ---- Conv2 + bias + ReLU: 3 banded matmuls ------------------------------
    # Band output columns are permuted to (w % 2, w // 2, c) so the W-pool is
    # a max of the two 64-lane halves.
    a2 = b2_ref[...]                                   # (1, 128)
    for kh in range(KH):
        rows = xp2_ref[:, pl.ds(kh, H), :].reshape(B * H, WP * C1)
        a2 = a2 + jnp.dot(rows, w2_ref[kh], preferred_element_type=f32)
    a2 = jnp.maximum(a2, 0.0)                          # (32, 128)
    a2_ref[...] = a2.reshape(B, HO, 2, W * C2)         # rows relabeled (b,ho,hi)

    # ---- 2x2 max-pool fused with FC1 (8 accumulated K=64 matmuls) ----------
    acc = bfc1_ref[...]                                # (1, HID) bias seeds acc
    for ho in range(HO):
        hp = jnp.maximum(a2_ref[:, ho, 0, :], a2_ref[:, ho, 1, :])   # (B, 128)
        pooled = jnp.maximum(hp[:, :WO * C2], hp[:, WO * C2:])       # (B, 64)
        acc = acc + jnp.dot(pooled, wfc1_ref[ho], preferred_element_type=f32)
    h1 = jnp.maximum(acc, 0.0)                         # (B, HID)

    # ---- FC2 (logits) --------------------------------------------------------
    out_ref[...] = jnp.dot(h1, wfc2_ref[...],
                           preferred_element_type=f32) + bfc2_ref[...]


def _full_spec(shape):
    return pl.BlockSpec(shape, lambda i: (0,) * len(shape))


@jax.jit
def cnn_forward(x_nchw, kp):
    # One-time input glue: NCHW -> NHWC, zero-pad spatially, flatten each row
    # to a (WP*C_IN)-wide lane-dense slab.
    x = jnp.transpose(x_nchw, (0, 2, 3, 1)).astype(jnp.float32)
    xp = jnp.pad(x, ((0, 0), (1, 1), (1, 1), (0, 0))).reshape(B, HP, WP * C_IN)

    kernel = pl.pallas_call(
        _cnn_kernel,
        out_shape=jax.ShapeDtypeStruct((B, OUT), jnp.float32),
        grid=(1,),
        in_specs=[
            _full_spec(xp.shape),
            _full_spec(kp["w1"].shape), _full_spec(kp["b1"].shape),
            _full_spec(kp["w2"].shape), _full_spec(kp["b2"].shape),
            _full_spec(kp["wfc1"].shape), _full_spec(kp["bfc1"].shape),
            _full_spec(kp["wfc2"].shape), _full_spec(kp["bfc2"].shape),
        ],
        out_specs=_full_spec((B, OUT)),
        scratch_shapes=[
            pltpu.VMEM((B, HP, WP * C1), jnp.float32),     # padded conv2 input
            pltpu.VMEM((B, HO, 2, W * C2), jnp.float32),   # conv2 output slab
        ],
        compiler_params=pltpu.CompilerParams(
            dimension_semantics=("arbitrary",)),
    )
    return kernel(xp, kp["w1"], kp["b1"], kp["w2"], kp["b2"],
                  kp["wfc1"], kp["bfc1"], kp["wfc2"], kp["bfc2"])


# ----------------------------- parameters -----------------------------------
def init_params(key):
    """Random parameters in the PyTorch layouts: Conv2d (Cout,Cin,KH,KW),
    Linear (out,in)."""
    ks = jax.random.split(key, 8)
    return {
        "conv_w": [0.1 * jax.random.normal(ks[0], (C1, C_IN, KH, KW), jnp.float32),
                   0.1 * jax.random.normal(ks[1], (C2, C1, KH, KW), jnp.float32)],
        "conv_b": [0.1 * jax.random.normal(ks[2], (C1,), jnp.float32),
                   0.1 * jax.random.normal(ks[3], (C2,), jnp.float32)],
        "fc_w": [0.1 * jax.random.normal(ks[4], (HID, C2 * HO * WO), jnp.float32),
                 0.1 * jax.random.normal(ks[5], (OUT, HID), jnp.float32)],
        "fc_b": [0.1 * jax.random.normal(ks[6], (HID,), jnp.float32),
                 0.1 * jax.random.normal(ks[7], (OUT,), jnp.float32)],
    }


def _conv1_band(w_oihw, b):
    """band[kh, wi*C_IN+ci, wp*C1+co]: per-kh block-banded weight whose output
    columns span the padded width (border columns all-zero => conv2's zero
    padding).  bias row matches the same column order."""
    w = jnp.transpose(w_oihw, (2, 3, 1, 0))                 # (KH, KW, C_IN, C1)
    band = jnp.zeros((KH, WP, C_IN, WP, C1), jnp.float32)
    for wo_p in range(1, W + 1):                            # interior output cols
        for kw in range(KW):
            band = band.at[:, wo_p - 1 + kw, :, wo_p, :].set(w[:, kw])
    brow = jnp.zeros((WP, C1), jnp.float32).at[1:W + 1, :].set(b)
    return band.reshape(KH, WP * C_IN, WP * C1), brow.reshape(1, WP * C1)


def _conv2_band(w_oihw, b):
    """band[kh, wi*C1+ci, (wo%2)*WO*C2 + (wo//2)*C2 + co]: output columns are
    permuted so the 2x2 W-pool is a max of the two 64-lane halves."""
    w = jnp.transpose(w_oihw, (2, 3, 1, 0))                 # (KH, KW, C1, C2)
    band = jnp.zeros((KH, WP, C1, 2, WO, C2), jnp.float32)
    for wo in range(W):
        for kw in range(KW):
            band = band.at[:, wo + kw, :, wo % 2, wo // 2, :].set(w[:, kw])
    brow = jnp.tile(b, W)                                   # independent of w
    return band.reshape(KH, WP * C1, W * C2), brow.reshape(1, W * C2)


def prepare_kernel_params(p):
    """One-time host-side layout prep (parameter preprocessing, no per-step
    compute): banded conv weights, and fc1 permuted to (HO, WO*C2, HID) to
    match the kernel's pooled-feature order and torch's NCHW flatten."""
    w1, b1 = _conv1_band(p["conv_w"][0], p["conv_b"][0])
    w2, b2 = _conv2_band(p["conv_w"][1], p["conv_b"][1])
    wfc1 = jnp.transpose(p["fc_w"][0].reshape(HID, C2, HO, WO),
                         (2, 3, 1, 0)).reshape(HO, WO * C2, HID)
    wfc2 = jnp.transpose(p["fc_w"][1])
    return {"w1": w1, "b1": b1, "w2": w2, "b2": b2,
            "wfc1": wfc1, "bfc1": p["fc_b"][0].reshape(1, HID),
            "wfc2": wfc2, "bfc2": p["fc_b"][1].reshape(1, OUT)}


# ----------------------------- pure-JAX reference ----------------------------
def reference_forward(x_nchw, p):
    hp = lax.Precision.HIGHEST
    x = x_nchw.astype(jnp.float32)
    for w, b in zip(p["conv_w"], p["conv_b"]):
        x = lax.conv_general_dilated(
            x, w, window_strides=(1, 1), padding="SAME",
            dimension_numbers=("NCHW", "OIHW", "NCHW"), precision=hp)
        x = jnp.maximum(x + b[None, :, None, None], 0.0)
    x = lax.reduce_window(x, -jnp.inf, lax.max,
                          (1, 1, 2, 2), (1, 1, 2, 2), "VALID")
    feats = x.reshape(x.shape[0], -1)
    feats = jnp.maximum(jnp.dot(feats, p["fc_w"][0].T, precision=hp)
                        + p["fc_b"][0], 0.0)
    return jnp.dot(feats, p["fc_w"][1].T, precision=hp) + p["fc_b"][1]


if __name__ == "__main__":
    key = jax.random.PRNGKey(0)
    k_x, k_p = jax.random.split(key)
    x = jax.random.normal(k_x, (B, C_IN, H, W), jnp.float32)   # NCHW, like torch
    params = init_params(k_p)
    kparams = prepare_kernel_params(params)

    out = cnn_forward(x, kparams)
    out = jax.block_until_ready(out)
    assert out.shape == (B, OUT), out.shape

    ref = reference_forward(x, params)
    assert jnp.allclose(out, ref, rtol=5e-3, atol=5e-3), \
        float(jnp.max(jnp.abs(out - ref)))

    print("KERNEL_OK")
</pallas_src>

<mosaic_0001>
module attributes {stable_mosaic.version = 11 : i64} {
  func.func @_cnn_kernel(%arg0: i32, %arg1: memref<2x18x72xf32, #tpu.memory_space<vmem>>, %arg2: memref<3x72x144xf32, #tpu.memory_space<vmem>>, %arg3: memref<1x144xf32, #tpu.memory_space<vmem>>, %arg4: memref<3x144x128xf32, #tpu.memory_space<vmem>>, %arg5: memref<1x128xf32, #tpu.memory_space<vmem>>, %arg6: memref<8x64x32xf32, #tpu.memory_space<vmem>>, %arg7: memref<1x32xf32, #tpu.memory_space<vmem>>, %arg8: memref<32x10xf32, #tpu.memory_space<vmem>>, %arg9: memref<1x10xf32, #tpu.memory_space<vmem>>, %arg10: memref<2x10xf32, #tpu.memory_space<vmem>>, %arg11: memref<2x18x144xf32, #tpu.memory_space<vmem>>, %arg12: memref<2x8x2x128xf32, #tpu.memory_space<vmem>>) attributes {dimension_semantics = [#tpu.dimension_semantics<arbitrary>], iteration_bounds = array<i64: 1>, scalar_prefetch = 0 : i64, scratch_operands = 2 : i64, tpu.core_type = #tpu.core_type<tc>, window_params = [{pipeline_mode = #tpu.pipeline_mode<synchronous>, transform_indices = @transform_0, window_bounds = array<i64: 2, 18, 72>}, {pipeline_mode = #tpu.pipeline_mode<synchronous>, transform_indices = @transform_1, window_bounds = array<i64: 3, 72, 144>}, {pipeline_mode = #tpu.pipeline_mode<synchronous>, transform_indices = @transform_2, window_bounds = array<i64: 1, 144>}, {pipeline_mode = #tpu.pipeline_mode<synchronous>, transform_indices = @transform_3, window_bounds = array<i64: 3, 144, 128>}, {pipeline_mode = #tpu.pipeline_mode<synchronous>, transform_indices = @transform_4, window_bounds = array<i64: 1, 128>}, {pipeline_mode = #tpu.pipeline_mode<synchronous>, transform_indices = @transform_5, window_bounds = array<i64: 8, 64, 32>}, {pipeline_mode = #tpu.pipeline_mode<synchronous>, transform_indices = @transform_6, window_bounds = array<i64: 1, 32>}, {pipeline_mode = #tpu.pipeline_mode<synchronous>, transform_indices = @transform_7, window_bounds = array<i64: 32, 10>}, {pipeline_mode = #tpu.pipeline_mode<synchronous>, transform_indices = @transform_8, window_bounds = array<i64: 1, 10>}, {pipeline_mode = #tpu.pipeline_mode<synchronous>, transform_indices = @transform_9, window_bounds = array<i64: 2, 10>}]} {
    %c0 = arith.constant 0 : index
    %c0_0 = arith.constant 0 : index
    %0 = vector.load %arg3[%c0, %c0_0] : memref<1x144xf32, #tpu.memory_space<vmem>>, vector<1x144xf32>
    %c0_1 = arith.constant 0 : index
    %c0_2 = arith.constant 0 : index
    %c0_3 = arith.constant 0 : index
    %1 = vector.load %arg1[%c0_1, %c0_2, %c0_3] : memref<2x18x72xf32, #tpu.memory_space<vmem>>, vector<2x16x72xf32>
    %2 = vector.shape_cast %1 : vector<2x16x72xf32> to vector<32x72xf32>
    %c0_4 = arith.constant 0 : index
    %c0_5 = arith.constant 0 : index
    %c0_6 = arith.constant 0 : index
    %3 = vector.load %arg2[%c0_4, %c0_5, %c0_6] : memref<3x72x144xf32, #tpu.memory_space<vmem>>, vector<1x72x144xf32>
    %4 = vector.shape_cast %3 : vector<1x72x144xf32> to vector<72x144xf32>
    %cst = arith.constant dense<0.000000e+00> : vector<32x144xf32>
    %5 = tpu.matmul %2, %4, %cst {dimension_numbers = #tpu.dot_dimension_numbers<[1], [0], [0], [1], [0, 0, 1, 1], [], []>} : vector<32x72xf32>, vector<72x144xf32>, vector<32x144xf32> -> vector<32x144xf32>
    %6 = vector.broadcast %0 : vector<1x144xf32> to vector<32x144xf32>
    %7 = arith.addf %6, %5 : vector<32x144xf32>
    %c0_7 = arith.constant 0 : index
    %c1 = arith.constant 1 : index
    %c0_8 = arith.constant 0 : index
    %8 = vector.load %arg1[%c0_7, %c1, %c0_8] : memref<2x18x72xf32, #tpu.memory_space<vmem>>, vector<2x16x72xf32>
    %9 = vector.shape_cast %8 : vector<2x16x72xf32> to vector<32x72xf32>
    %c1_9 = arith.constant 1 : index
    %c0_10 = arith.constant 0 : index
    %c0_11 = arith.constant 0 : index
    %10 = vector.load %arg2[%c1_9, %c0_10, %c0_11] : memref<3x72x144xf32, #tpu.memory_space<vmem>>, vector<1x72x144xf32>
    %11 = vector.shape_cast %10 : vector<1x72x144xf32> to vector<72x144xf32>
    %cst_12 = arith.constant dense<0.000000e+00> : vector<32x144xf32>
    %12 = tpu.matmul %9, %11, %cst_12 {dimension_numbers = #tpu.dot_dimension_numbers<[1], [0], [0], [1], [0, 0, 1, 1], [], []>} : vector<32x72xf32>, vector<72x144xf32>, vector<32x144xf32> -> vector<32x144xf32>
    %13 = arith.addf %7, %12 : vector<32x144xf32>
    %c0_13 = arith.constant 0 : index
    %c2 = arith.constant 2 : index
    %c0_14 = arith.constant 0 : index
    %14 = vector.load %arg1[%c0_13, %c2, %c0_14] : memref<2x18x72xf32, #tpu.memory_space<vmem>>, vector<2x16x72xf32>
    %15 = vector.shape_cast %14 : vector<2x16x72xf32> to vector<32x72xf32>
    %c2_15 = arith.constant 2 : index
    %c0_16 = arith.constant 0 : index
    %c0_17 = arith.constant 0 : index
    %16 = vector.load %arg2[%c2_15, %c0_16, %c0_17] : memref<3x72x144xf32, #tpu.memory_space<vmem>>, vector<1x72x144xf32>
    %17 = vector.shape_cast %16 : vector<1x72x144xf32> to vector<72x144xf32>
    %cst_18 = arith.constant dense<0.000000e+00> : vector<32x144xf32>
    %18 = tpu.matmul %15, %17, %cst_18 {dimension_numbers = #tpu.dot_dimension_numbers<[1], [0], [0], [1], [0, 0, 1, 1], [], []>} : vector<32x72xf32>, vector<72x144xf32>, vector<32x144xf32> -> vector<32x144xf32>
    %19 = arith.addf %13, %18 : vector<32x144xf32>
    %cst_19 = arith.constant 0.000000e+00 : f32
    %20 = vector.broadcast %cst_19 : f32 to vector<32x144xf32>
    %21 = arith.maximumf %19, %20 : vector<32x144xf32>
    %cst_20 = arith.constant 0.000000e+00 : f32
    %22 = vector.broadcast %cst_20 : f32 to vector<2x1x144xf32>
    %c0_21 = arith.constant 0 : index
    %c0_22 = arith.constant 0 : index
    %c0_23 = arith.constant 0 : index
    %23 = vector.load %arg11[%c0_21, %c0_22, %c0_23] : memref<2x18x144xf32, #tpu.memory_space<vmem>>, vector<2x1x144xf32>
    tpu.vector_store %arg11[%c0_21, %c0_22, %c0_23], %22 {strides = array<i32>} : memref<2x18x144xf32, #tpu.memory_space<vmem>>, vector<2x1x144xf32>,
    %c0_24 = arith.constant 0 : index
    %c17 = arith.constant 17 : index
    %c0_25 = arith.constant 0 : index
    %24 = vector.load %arg11[%c0_24, %c17, %c0_25] : memref<2x18x144xf32, #tpu.memory_space<vmem>>, vector<2x1x144xf32>
    tpu.vector_store %arg11[%c0_24, %c17, %c0_25], %22 {strides = array<i32>} : memref<2x18x144xf32, #tpu.memory_space<vmem>>, vector<2x1x144xf32>,
    %25 = vector.shape_cast %21 : vector<32x144xf32> to vector<2x16x144xf32>
    %c0_26 = arith.constant 0 : index
    %c1_27 = arith.constant 1 : index
    %c0_28 = arith.constant 0 : index
    %26 = vector.load %arg11[%c0_26, %c1_27, %c0_28] : memref<2x18x144xf32, #tpu.memory_space<vmem>>, vector<2x16x144xf32>
    tpu.vector_store %arg11[%c0_26, %c1_27, %c0_28], %25 {strides = array<i32>} : memref<2x18x144xf32, #tpu.memory_space<vmem>>, vector<2x16x144xf32>,
    %c0_29 = arith.constant 0 : index
    %c0_30 = arith.constant 0 : index
    %27 = vector.load %arg5[%c0_29, %c0_30] : memref<1x128xf32, #tpu.memory_space<vmem>>, vector<1x128xf32>
    %c0_31 = arith.constant 0 : index
    %c0_32 = arith.constant 0 : index
    %c0_33 = arith.constant 0 : index
    %28 = vector.load %arg11[%c0_31, %c0_32, %c0_33] : memref<2x18x144xf32, #tpu.memory_space<vmem>>, vector<2x16x144xf32>
    %29 = vector.shape_cast %28 : vector<2x16x144xf32> to vector<32x144xf32>
    %c0_34 = arith.constant 0 : index
    %c0_35 = arith.constant 0 : index
    %c0_36 = arith.constant 0 : index
    %30 = vector.load %arg4[%c0_34, %c0_35, %c0_36] : memref<3x144x128xf32, #tpu.memory_space<vmem>>, vector<1x144x128xf32>
    %31 = vector.shape_cast %30 : vector<1x144x128xf32> to vector<144x128xf32>
    %cst_37 = arith.constant dense<0.000000e+00> : vector<32x128xf32>
    %32 = tpu.matmul %29, %31, %cst_37 {dimension_numbers = #tpu.dot_dimension_numbers<[1], [0], [0], [1], [0, 0, 1, 1], [], []>} : vector<32x144xf32>, vector<144x128xf32>, vector<32x128xf32> -> vector<32x128xf32>
    %33 = vector.broadcast %27 : vector<1x128xf32> to vector<32x128xf32>
    %34 = arith.addf %33, %32 : vector<32x128xf32>
    %c0_38 = arith.constant 0 : index
    %c1_39 = arith.constant 1 : index
    %c0_40 = arith.constant 0 : index
    %35 = vector.load %arg11[%c0_38, %c1_39, %c0_40] : memref<2x18x144xf32, #tpu.memory_space<vmem>>, vector<2x16x144xf32>
    %36 = vector.shape_cast %35 : vector<2x16x144xf32> to vector<32x144xf32>
    %c1_41 = arith.constant 1 : index
    %c0_42 = arith.constant 0 : index
    %c0_43 = arith.constant 0 : index
    %37 = vector.load %arg4[%c1_41, %c0_42, %c0_43] : memref<3x144x128xf32, #tpu.memory_space<vmem>>, vector<1x144x128xf32>
    %38 = vector.shape_cast %37 : vector<1x144x128xf32> to vector<144x128xf32>
    %cst_44 = arith.constant dense<0.000000e+00> : vector<32x128xf32>
    %39 = tpu.matmul %36, %38, %cst_44 {dimension_numbers = #tpu.dot_dimension_numbers<[1], [0], [0], [1], [0, 0, 1, 1], [], []>} : vector<32x144xf32>, vector<144x128xf32>, vector<32x128xf32> -> vector<32x128xf32>
    %40 = arith.addf %34, %39 : vector<32x128xf32>
    %c0_45 = arith.constant 0 : index
    %c2_46 = arith.constant 2 : index
    %c0_47 = arith.constant 0 : index
    %41 = vector.load %arg11[%c0_45, %c2_46, %c0_47] : memref<2x18x144xf32, #tpu.memory_space<vmem>>, vector<2x16x144xf32>
    %42 = vector.shape_cast %41 : vector<2x16x144xf32> to vector<32x144xf32>
    %c2_48 = arith.constant 2 : index
    %c0_49 = arith.constant 0 : index
    %c0_50 = arith.constant 0 : index
    %43 = vector.load %arg4[%c2_48, %c0_49, %c0_50] : memref<3x144x128xf32, #tpu.memory_space<vmem>>, vector<1x144x128xf32>
    %44 = vector.shape_cast %43 : vector<1x144x128xf32> to vector<144x128xf32>
    %cst_51 = arith.constant dense<0.000000e+00> : vector<32x128xf32>
    %45 = tpu.matmul %42, %44, %cst_51 {dimension_numbers = #tpu.dot_dimension_numbers<[1], [0], [0], [1], [0, 0, 1, 1], [], []>} : vector<32x144xf32>, vector<144x128xf32>, vector<32x128xf32> -> vector<32x128xf32>
    %46 = arith.addf %40, %45 : vector<32x128xf32>
    %cst_52 = arith.constant 0.000000e+00 : f32
    %47 = vector.broadcast %cst_52 : f32 to vector<32x128xf32>
    %48 = arith.maximumf %46, %47 : vector<32x128xf32>
    %49 = vector.shape_cast %48 : vector<32x128xf32> to vector<2x8x2x128xf32>
    %c0_53 = arith.constant 0 : index
    %c0_54 = arith.constant 0 : index
    %c0_55 = arith.constant 0 : index
    %c0_56 = arith.constant 0 : index
    %50 = vector.load %arg12[%c0_53, %c0_54, %c0_55, %c0_56] : memref<2x8x2x128xf32, #tpu.memory_space<vmem>>, vector<2x8x2x128xf32>
    tpu.vector_store %arg12[%c0_53, %c0_54, %c0_55, %c0_56], %49 {strides = array<i32>} : memref<2x8x2x128xf32, #tpu.memory_space<vmem>>, vector<2x8x2x128xf32>,
    %c0_57 = arith.constant 0 : index
    %c0_58 = arith.constant 0 : index
    %51 = vector.load %arg7[%c0_57, %c0_58] : memref<1x32xf32, #tpu.memory_space<vmem>>, vector<1x32xf32>
    %c0_59 = arith.constant 0 : index
    %c0_60 = arith.constant 0 : index
    %c0_61 = arith.constant 0 : index
    %c0_62 = arith.constant 0 : index
    %52 = vector.load %arg12[%c0_59, %c0_60, %c0_61, %c0_62] : memref<2x8x2x128xf32, #tpu.memory_space<vmem>>, vector<2x1x1x128xf32>
    %53 = vector.shape_cast %52 : vector<2x1x1x128xf32> to vector<2x128xf32>
    %c0_63 = arith.constant 0 : index
    %c0_64 = arith.constant 0 : index
    %c1_65 = arith.constant 1 : index
    %c0_66 = arith.constant 0 : index
    %54 = vector.load %arg12[%c0_63, %c0_64, %c1_65, %c0_66] : memref<2x8x2x128xf32, #tpu.memory_space<vmem>>, vector<2x1x1x128xf32>
    %55 = vector.shape_cast %54 : vector<2x1x1x128xf32> to vector<2x128xf32>
    %56 = arith.maximumf %53, %55 : vector<2x128xf32>
    %57 = vector.extract_strided_slice %56 {offsets = [0, 0], sizes = [2, 64], strides = [1, 1]} : vector<2x128xf32> to vector<2x64xf32>
    %58 = vector.extract_strided_slice %56 {offsets = [0, 64], sizes = [2, 64], strides = [1, 1]} : vector<2x128xf32> to vector<2x64xf32>
    %59 = arith.maximumf %57, %58 : vector<2x64xf32>
    %c0_67 = arith.constant 0 : index
    %c0_68 = arith.constant 0 : index
    %c0_69 = arith.constant 0 : index
    %60 = vector.load %arg6[%c0_67, %c0_68, %c0_69] : memref<8x64x32xf32, #tpu.memory_space<vmem>>, vector<1x64x32xf32>
    %61 = vector.shape_cast %60 : vector<1x64x32xf32> to vector<64x32xf32>
    %cst_70 = arith.constant dense<0.000000e+00> : vector<2x32xf32>
    %62 = tpu.matmul %59, %61, %cst_70 {dimension_numbers = #tpu.dot_dimension_numbers<[1], [0], [0], [1], [0, 0, 1, 1], [], []>} : vector<2x64xf32>, vector<64x32xf32>, vector<2x32xf32> -> vector<2x32xf32>
    %63 = vector.broadcast %51 : vector<1x32xf32> to vector<2x32xf32>
    %64 = arith.addf %63, %62 : vector<2x32xf32>
    %c0_71 = arith.constant 0 : index
    %c1_72 = arith.constant 1 : index
    %c0_73 = arith.constant 0 : index
    %c0_74 = arith.constant 0 : index
    %65 = vector.load %arg12[%c0_71, %c1_72, %c0_73, %c0_74] : memref<2x8x2x128xf32, #tpu.memory_space<vmem>>, vector<2x1x1x128xf32>
    %66 = vector.shape_cast %65 : vector<2x1x1x128xf32> to vector<2x128xf32>
    %c0_75 = arith.constant 0 : index
    %c1_76 = arith.constant 1 : index
    %c1_77 = arith.constant 1 : index
    %c0_78 = arith.constant 0 : index
    %67 = vector.load %arg12[%c0_75, %c1_76, %c1_77, %c0_78] : memref<2x8x2x128xf32, #tpu.memory_space<vmem>>, vector<2x1x1x128xf32>
    %68 = vector.shape_cast %67 : vector<2x1x1x128xf32> to vector<2x128xf32>
    %69 = arith.maximumf %66, %68 : vector<2x128xf32>
    %70 = vector.extract_strided_slice %69 {offsets = [0, 0], sizes = [2, 64], strides = [1, 1]} : vector<2x128xf32> to vector<2x64xf32>
    %71 = vector.extract_strided_slice %69 {offsets = [0, 64], sizes = [2, 64], strides = [1, 1]} : vector<2x128xf32> to vector<2x64xf32>
    %72 = arith.maximumf %70, %71 : vector<2x64xf32>
    %c1_79 = arith.constant 1 : index
    %c0_80 = arith.constant 0 : index
    %c0_81 = arith.constant 0 : index
    %73 = vector.load %arg6[%c1_79, %c0_80, %c0_81] : memref<8x64x32xf32, #tpu.memory_space<vmem>>, vector<1x64x32xf32>
    %74 = vector.shape_cast %73 : vector<1x64x32xf32> to vector<64x32xf32>
    %cst_82 = arith.constant dense<0.000000e+00> : vector<2x32xf32>
    %75 = tpu.matmul %72, %74, %cst_82 {dimension_numbers = #tpu.dot_dimension_numbers<[1], [0], [0], [1], [0, 0, 1, 1], [], []>} : vector<2x64xf32>, vector<64x32xf32>, vector<2x32xf32> -> vector<2x32xf32>
    %76 = arith.addf %64, %75 : vector<2x32xf32>
    %c0_83 = arith.constant 0 : index
    %c2_84 = arith.constant 2 : index
    %c0_85 = arith.constant 0 : index
    %c0_86 = arith.constant 0 : index
    %77 = vector.load %arg12[%c0_83, %c2_84, %c0_85, %c0_86] : memref<2x8x2x128xf32, #tpu.memory_space<vmem>>, vector<2x1x1x128xf32>
    %78 = vector.shape_cast %77 : vector<2x1x1x128xf32> to vector<2x128xf32>
    %c0_87 = arith.constant 0 : index
    %c2_88 = arith.constant 2 : index
    %c1_89 = arith.constant 1 : index
    %c0_90 = arith.constant 0 : index
    %79 = vector.load %arg12[%c0_87, %c2_88, %c1_89, %c0_90] : memref<2x8x2x128xf32, #tpu.memory_space<vmem>>, vector<2x1x1x128xf32>
    %80 = vector.shape_cast %79 : vector<2x1x1x128xf32> to vector<2x128xf32>
    %81 = arith.maximumf %78, %80 : vector<2x128xf32>
    %82 = vector.extract_strided_slice %81 {offsets = [0, 0], sizes = [2, 64], strides = [1, 1]} : vector<2x128xf32> to vector<2x64xf32>
    %83 = vector.extract_strided_slice %81 {offsets = [0, 64], sizes = [2, 64], strides = [1, 1]} : vector<2x128xf32> to vector<2x64xf32>
    %84 = arith.maximumf %82, %83 : vector<2x64xf32>
    %c2_91 = arith.constant 2 : index
    %c0_92 = arith.constant 0 : index
    %c0_93 = arith.constant 0 : index
    %85 = vector.load %arg6[%c2_91, %c0_92, %c0_93] : memref<8x64x32xf32, #tpu.memory_space<vmem>>, vector<1x64x32xf32>
    %86 = vector.shape_cast %85 : vector<1x64x32xf32> to vector<64x32xf32>
    %cst_94 = arith.constant dense<0.000000e+00> : vector<2x32xf32>
    %87 = tpu.matmul %84, %86, %cst_94 {dimension_numbers = #tpu.dot_dimension_numbers<[1], [0], [0], [1], [0, 0, 1, 1], [], []>} : vector<2x64xf32>, vector<64x32xf32>, vector<2x32xf32> -> vector<2x32xf32>
    %88 = arith.addf %76, %87 : vector<2x32xf32>
    %c0_95 = arith.constant 0 : index
    %c3 = arith.constant 3 : index
    %c0_96 = arith.constant 0 : index
    %c0_97 = arith.constant 0 : index
    %89 = vector.load %arg12[%c0_95, %c3, %c0_96, %c0_97] : memref<2x8x2x128xf32, #tpu.memory_space<vmem>>, vector<2x1x1x128xf32>
    %90 = vector.shape_cast %89 : vector<2x1x1x128xf32> to vector<2x128xf32>
    %c0_98 = arith.constant 0 : index
    %c3_99 = arith.constant 3 : index
    %c1_100 = arith.constant 1 : index
    %c0_101 = arith.constant 0 : index
    %91 = vector.load %arg12[%c0_98, %c3_99, %c1_100, %c0_101] : memref<2x8x2x128xf32, #tpu.memory_space<vmem>>, vector<2x1x1x128xf32>
    %92 = vector.shape_cast %91 : vector<2x1x1x128xf32> to vector<2x128xf32>
    %93 = arith.maximumf %90, %92 : vector<2x128xf32>
    %94 = vector.extract_strided_slice %93 {offsets = [0, 0], sizes = [2, 64], strides = [1, 1]} : vector<2x128xf32> to vector<2x64xf32>
    %95 = vector.extract_strided_slice %93 {offsets = [0, 64], sizes = [2, 64], strides = [1, 1]} : vector<2x128xf32> to vector<2x64xf32>
    %96 = arith.maximumf %94, %95 : vector<2x64xf32>
    %c3_102 = arith.constant 3 : index
    %c0_103 = arith.constant 0 : index
    %c0_104 = arith.constant 0 : index
    %97 = vector.load %arg6[%c3_102, %c0_103, %c0_104] : memref<8x64x32xf32, #tpu.memory_space<vmem>>, vector<1x64x32xf32>
    %98 = vector.shape_cast %97 : vector<1x64x32xf32> to vector<64x32xf32>
    %cst_105 = arith.constant dense<0.000000e+00> : vector<2x32xf32>
    %99 = tpu.matmul %96, %98, %cst_105 {dimension_numbers = #tpu.dot_dimension_numbers<[1], [0], [0], [1], [0, 0, 1, 1], [], []>} : vector<2x64xf32>, vector<64x32xf32>, vector<2x32xf32> -> vector<2x32xf32>
    %100 = arith.addf %88, %99 : vector<2x32xf32>
    %c0_106 = arith.constant 0 : index
    %c4 = arith.constant 4 : index
    %c0_107 = arith.constant 0 : index
    %c0_108 = arith.constant 0 : index
    %101 = vector.load %arg12[%c0_106, %c4, %c0_107, %c0_108] : memref<2x8x2x128xf32, #tpu.memory_space<vmem>>, vector<2x1x1x128xf32>
    %102 = vector.shape_cast %101 : vector<2x1x1x128xf32> to vector<2x128xf32>
    %c0_109 = arith.constant 0 : index
    %c4_110 = arith.constant 4 : index
    %c1_111 = arith.constant 1 : index
    %c0_112 = arith.constant 0 : index
    %103 = vector.load %arg12[%c0_109, %c4_110, %c1_111, %c0_112] : memref<2x8x2x128xf32, #tpu.memory_space<vmem>>, vector<2x1x1x128xf32>
    %104 = vector.shape_cast %103 : vector<2x1x1x128xf32> to vector<2x128xf32>
    %105 = arith.maximumf %102, %104 : vector<2x128xf32>
    %106 = vector.extract_strided_slice %105 {offsets = [0, 0], sizes = [2, 64], strides = [1, 1]} : vector<2x128xf32> to vector<2x64xf32>
    %107 = vector.extract_strided_slice %105 {offsets = [0, 64], sizes = [2, 64], strides = [1, 1]} : vector<2x128xf32> to vector<2x64xf32>
    %108 = arith.maximumf %106, %107 : vector<2x64xf32>
    %c4_113 = arith.constant 4 : index
    %c0_114 = arith.constant 0 : index
    %c0_115 = arith.constant 0 : index
    %109 = vector.load %arg6[%c4_113, %c0_114, %c0_115] : memref<8x64x32xf32, #tpu.memory_space<vmem>>, vector<1x64x32xf32>
    %110 = vector.shape_cast %109 : vector<1x64x32xf32> to vector<64x32xf32>
    %cst_116 = arith.constant dense<0.000000e+00> : vector<2x32xf32>
    %111 = tpu.matmul %108, %110, %cst_116 {dimension_numbers = #tpu.dot_dimension_numbers<[1], [0], [0], [1], [0, 0, 1, 1], [], []>} : vector<2x64xf32>, vector<64x32xf32>, vector<2x32xf32> -> vector<2x32xf32>
    %112 = arith.addf %100, %111 : vector<2x32xf32>
    %c0_117 = arith.constant 0 : index
    %c5 = arith.constant 5 : index
    %c0_118 = arith.constant 0 : index
    %c0_119 = arith.constant 0 : index
    %113 = vector.load %arg12[%c0_117, %c5, %c0_118, %c0_119] : memref<2x8x2x128xf32, #tpu.memory_space<vmem>>, vector<2x1x1x128xf32>
    %114 = vector.shape_cast %113 : vector<2x1x1x128xf32> to vector<2x128xf32>
    %c0_120 = arith.constant 0 : index
    %c5_121 = arith.constant 5 : index
    %c1_122 = arith.constant 1 : index
    %c0_123 = arith.constant 0 : index
    %115 = vector.load %arg12[%c0_120, %c5_121, %c1_122, %c0_123] : memref<2x8x2x128xf32, #tpu.memory_space<vmem>>, vector<2x1x1x128xf32>
    %116 = vector.shape_cast %115 : vector<2x1x1x128xf32> to vector<2x128xf32>
    %117 = arith.maximumf %114, %116 : vector<2x128xf32>
    %118 = vector.extract_strided_slice %117 {offsets = [0, 0], sizes = [2, 64], strides = [1, 1]} : vector<2x128xf32> to vector<2x64xf32>
    %119 = vector.extract_strided_slice %117 {offsets = [0, 64], sizes = [2, 64], strides = [1, 1]} : vector<2x128xf32> to vector<2x64xf32>
    %120 = arith.maximumf %118, %119 : vector<2x64xf32>
    %c5_124 = arith.constant 5 : index
    %c0_125 = arith.constant 0 : index
    %c0_126 = arith.constant 0 : index
    %121 = vector.load %arg6[%c5_124, %c0_125, %c0_126] : memref<8x64x32xf32, #tpu.memory_space<vmem>>, vector<1x64x32xf32>
    %122 = vector.shape_cast %121 : vector<1x64x32xf32> to vector<64x32xf32>
    %cst_127 = arith.constant dense<0.000000e+00> : vector<2x32xf32>
    %123 = tpu.matmul %120, %122, %cst_127 {dimension_numbers = #tpu.dot_dimension_numbers<[1], [0], [0], [1], [0, 0, 1, 1], [], []>} : vector<2x64xf32>, vector<64x32xf32>, vector<2x32xf32> -> vector<2x32xf32>
    %124 = arith.addf %112, %123 : vector<2x32xf32>
    %c0_128 = arith.constant 0 : index
    %c6 = arith.constant 6 : index
    %c0_129 = arith.constant 0 : index
    %c0_130 = arith.constant 0 : index
    %125 = vector.load %arg12[%c0_128, %c6, %c0_129, %c0_130] : memref<2x8x2x128xf32, #tpu.memory_space<vmem>>, vector<2x1x1x128xf32>
    %126 = vector.shape_cast %125 : vector<2x1x1x128xf32> to vector<2x128xf32>
    %c0_131 = arith.constant 0 : index
    %c6_132 = arith.constant 6 : index
    %c1_133 = arith.constant 1 : index
    %c0_134 = arith.constant 0 : index
    %127 = vector.load %arg12[%c0_131, %c6_132, %c1_133, %c0_134] : memref<2x8x2x128xf32, #tpu.memory_space<vmem>>, vector<2x1x1x128xf32>
    %128 = vector.shape_cast %127 : vector<2x1x1x128xf32> to vector<2x128xf32>
    %129 = arith.maximumf %126, %128 : vector<2x128xf32>
    %130 = vector.extract_strided_slice %129 {offsets = [0, 0], sizes = [2, 64], strides = [1, 1]} : vector<2x128xf32> to vector<2x64xf32>
    %131 = vector.extract_strided_slice %129 {offsets = [0, 64], sizes = [2, 64], strides = [1, 1]} : vector<2x128xf32> to vector<2x64xf32>
    %132 = arith.maximumf %130, %131 : vector<2x64xf32>
    %c6_135 = arith.constant 6 : index
    %c0_136 = arith.constant 0 : index
    %c0_137 = arith.constant 0 : index
    %133 = vector.load %arg6[%c6_135, %c0_136, %c0_137] : memref<8x64x32xf32, #tpu.memory_space<vmem>>, vector<1x64x32xf32>
    %134 = vector.shape_cast %133 : vector<1x64x32xf32> to vector<64x32xf32>
    %cst_138 = arith.constant dense<0.000000e+00> : vector<2x32xf32>
    %135 = tpu.matmul %132, %134, %cst_138 {dimension_numbers = #tpu.dot_dimension_numbers<[1], [0], [0], [1], [0, 0, 1, 1], [], []>} : vector<2x64xf32>, vector<64x32xf32>, vector<2x32xf32> -> vector<2x32xf32>
    %136 = arith.addf %124, %135 : vector<2x32xf32>
    %c0_139 = arith.constant 0 : index
    %c7 = arith.constant 7 : index
    %c0_140 = arith.constant 0 : index
    %c0_141 = arith.constant 0 : index
    %137 = vector.load %arg12[%c0_139, %c7, %c0_140, %c0_141] : memref<2x8x2x128xf32, #tpu.memory_space<vmem>>, vector<2x1x1x128xf32>
    %138 = vector.shape_cast %137 : vector<2x1x1x128xf32> to vector<2x128xf32>
    %c0_142 = arith.constant 0 : index
    %c7_143 = arith.constant 7 : index
    %c1_144 = arith.constant 1 : index
    %c0_145 = arith.constant 0 : index
    %139 = vector.load %arg12[%c0_142, %c7_143, %c1_144, %c0_145] : memref<2x8x2x128xf32, #tpu.memory_space<vmem>>, vector<2x1x1x128xf32>
    %140 = vector.shape_cast %139 : vector<2x1x1x128xf32> to vector<2x128xf32>
    %141 = arith.maximumf %138, %140 : vector<2x128xf32>
    %142 = vector.extract_strided_slice %141 {offsets = [0, 0], sizes = [2, 64], strides = [1, 1]} : vector<2x128xf32> to vector<2x64xf32>
    %143 = vector.extract_strided_slice %141 {offsets = [0, 64], sizes = [2, 64], strides = [1, 1]} : vector<2x128xf32> to vector<2x64xf32>
    %144 = arith.maximumf %142, %143 : vector<2x64xf32>
    %c7_146 = arith.constant 7 : index
    %c0_147 = arith.constant 0 : index
    %c0_148 = arith.constant 0 : index
    %145 = vector.load %arg6[%c7_146, %c0_147, %c0_148] : memref<8x64x32xf32, #tpu.memory_space<vmem>>, vector<1x64x32xf32>
    %146 = vector.shape_cast %145 : vector<1x64x32xf32> to vector<64x32xf32>
    %cst_149 = arith.constant dense<0.000000e+00> : vector<2x32xf32>
    %147 = tpu.matmul %144, %146, %cst_149 {dimension_numbers = #tpu.dot_dimension_numbers<[1], [0], [0], [1], [0, 0, 1, 1], [], []>} : vector<2x64xf32>, vector<64x32xf32>, vector<2x32xf32> -> vector<2x32xf32>
    %148 = arith.addf %136, %147 : vector<2x32xf32>
    %cst_150 = arith.constant 0.000000e+00 : f32
    %149 = vector.broadcast %cst_150 : f32 to vector<2x32xf32>
    %150 = arith.maximumf %148, %149 : vector<2x32xf32>
    %c0_151 = arith.constant 0 : index
    %c0_152 = arith.constant 0 : index
    %151 = vector.load %arg8[%c0_151, %c0_152] : memref<32x10xf32, #tpu.memory_space<vmem>>, vector<32x10xf32>
    %cst_153 = arith.constant dense<0.000000e+00> : vector<2x10xf32>
    %152 = tpu.matmul %150, %151, %cst_153 {dimension_numbers = #tpu.dot_dimension_numbers<[1], [0], [0], [1], [0, 0, 1, 1], [], []>} : vector<2x32xf32>, vector<32x10xf32>, vector<2x10xf32> -> vector<2x10xf32>
    %c0_154 = arith.constant 0 : index
    %c0_155 = arith.constant 0 : index
    %153 = vector.load %arg9[%c0_154, %c0_155] : memref<1x10xf32, #tpu.memory_space<vmem>>, vector<1x10xf32>
    %154 = vector.broadcast %153 : vector<1x10xf32> to vector<2x10xf32>
    %155 = arith.addf %152, %154 : vector<2x10xf32>
    %c0_156 = arith.constant 0 : index
    %c0_157 = arith.constant 0 : index
    %156 = vector.load %arg10[%c0_156, %c0_157] : memref<2x10xf32, #tpu.memory_space<vmem>>, vector<2x10xf32>
    tpu.vector_store %arg10[%c0_156, %c0_157], %155 {strides = array<i32>} : memref<2x10xf32, #tpu.memory_space<vmem>>, vector<2x10xf32>,
    return
  }
  func.func @transform_0(%arg0: i32) -> (i32, i32, i32) {
    %c0_i32 = arith.constant 0 : i32
    %c0_i32_0 = arith.constant 0 : i32
    %c0_i32_1 = arith.constant 0 : i32
    %c0_i32_2 = arith.constant 0 : i32
    return %c0_i32, %c0_i32_0, %c0_i32_1 : i32, i32, i32
  }
  func.func @transform_1(%arg0: i32) -> (i32, i32, i32) {
    %c0_i32 = arith.constant 0 : i32
    %c0_i32_0 = arith.constant 0 : i32
    %c0_i32_1 = arith.constant 0 : i32
    %c0_i32_2 = arith.constant 0 : i32
    return %c0_i32, %c0_i32_0, %c0_i32_1 : i32, i32, i32
  }
  func.func @transform_2(%arg0: i32) -> (i32, i32) {
    %c0_i32 = arith.constant 0 : i32
    %c0_i32_0 = arith.constant 0 : i32
    %c0_i32_1 = arith.constant 0 : i32
    return %c0_i32, %c0_i32_0 : i32, i32
  }
  func.func @transform_3(%arg0: i32) -> (i32, i32, i32) {
    %c0_i32 = arith.constant 0 : i32
    %c0_i32_0 = arith.constant 0 : i32
    %c0_i32_1 = arith.constant 0 : i32
    %c0_i32_2 = arith.constant 0 : i32
    return %c0_i32, %c0_i32_0, %c0_i32_1 : i32, i32, i32
  }
  func.func @transform_4(%arg0: i32) -> (i32, i32) {
    %c0_i32 = arith.constant 0 : i32
    %c0_i32_0 = arith.constant 0 : i32
    %c0_i32_1 = arith.constant 0 : i32
    return %c0_i32, %c0_i32_0 : i32, i32
  }
  func.func @transform_5(%arg0: i32) -> (i32, i32, i32) {
    %c0_i32 = arith.constant 0 : i32
    %c0_i32_0 = arith.constant 0 : i32
    %c0_i32_1 = arith.constant 0 : i32
    %c0_i32_2 = arith.constant 0 : i32
    return %c0_i32, %c0_i32_0, %c0_i32_1 : i32, i32, i32
  }
  func.func @transform_6(%arg0: i32) -> (i32, i32) {
    %c0_i32 = arith.constant 0 : i32
    %c0_i32_0 = arith.constant 0 : i32
    %c0_i32_1 = arith.constant 0 : i32
    return %c0_i32, %c0_i32_0 : i32, i32
  }
  func.func @transform_7(%arg0: i32) -> (i32, i32) {
    %c0_i32 = arith.constant 0 : i32
    %c0_i32_0 = arith.constant 0 : i32
    %c0_i32_1 = arith.constant 0 : i32
    return %c0_i32, %c0_i32_0 : i32, i32
  }
  func.func @transform_8(%arg0: i32) -> (i32, i32) {
    %c0_i32 = arith.constant 0 : i32
    %c0_i32_0 = arith.constant 0 : i32
    %c0_i32_1 = arith.constant 0 : i32
    return %c0_i32, %c0_i32_0 : i32, i32
  }
  func.func @transform_9(%arg0: i32) -> (i32, i32) {
    %c0_i32 = arith.constant 0 : i32
    %c0_i32_0 = arith.constant 0 : i32
    %c0_i32_1 = arith.constant 0 : i32
    return %c0_i32, %c0_i32_0 : i32, i32
  }
}

</mosaic_0001>

<bundles_post_ra>
// kernel: cnn_forward.1
= control target key start
LH: loop header
LB: loop body
LE: loop exit
PB: predicated region body
PF: predicated region fallthrough
CT: control target
= control target key end

     0   :  { %vm56_vm0 = vcmask 588800   ;;  %s2373_s0 = inlined_call_operand.vmem [shape: f32[2,18,72], index: 0, kind: input, shape index: {}]   ;;  %s2374_s1 = inlined_call_operand.vmem [shape: f32[3,72,144], index: 1, kind: input, shape index: {}]   ;;  %s2375_s2 = inlined_call_operand.vmem [shape: f32[1,144], index: 2, kind: input, shape index: {}]   ;;  %s2376_s3 = inlined_call_operand.vmem [shape: f32[3,144,128], index: 3, kind: input, shape index: {}]   ;;  %s2377_s4 = inlined_call_operand.vmem [shape: f32[1,128], index: 4, kind: input, shape index: {}]   ;;  %s2378_s5 = inlined_call_operand.vmem [shape: f32[8,64,32], index: 5, kind: input, shape index: {}]   ;;  %s2379_s6 = inlined_call_operand.vmem [shape: f32[1,32], index: 6, kind: input, shape index: {}]   ;;  %s2380_s7 = inlined_call_operand.vmem [shape: f32[32,10], index: 7, kind: input, shape index: {}]   ;;  %s2381_s8 = inlined_call_operand.vmem [shape: f32[1,10], index: 8, kind: input, shape index: {}]   ;;  %s2382_s9 = inlined_call_operand.hbm [shape: f32[2,10], index: 9, kind: output, shape index: {}]  }
   0x1   :  { %v54_v0 = vld [vmem:[%s2374_s1 + $0x80] sm:$0xff]  ;;  %v55_v1 = vld [vmem:[%s2374_s1 + $0x88] sm:$0xff]  ;;  %v1336_v2 = vld [vmem:[%s2374_s1 + $0x110] sm:$0xff] }
   0x2   :  { %76 = vmatpush.msra.mxu0 %v54_v0  ;;  %105 = vmatpush.msra.mxu1 %v55_v1  ;;  %v1337_v3 = vld [vmem:[%s2374_s1 + $0x118] sm:$0xff]  ;;  %v52_v4 = vld [vmem:[%s2374_s1 + $0x70] sm:$0xff]  ;;  %v1334_v6 = vld [vmem:[%s2374_s1 + $0x100] sm:$0xff] }
   0x3   :  { %v53_v5 = vld [vmem:[%s2374_s1 + $0x78] sm:$0xff]  ;;  %182 = vmatpush.msra.mxu2 %v1336_v2  ;;  %211 = vmatpush.msra.mxu3 %v1337_v3  ;;  %v1335_v7 = vld [vmem:[%s2374_s1 + $0x108] sm:$0xff]  ;;  %v50_v8 = vld [vmem:[%s2374_s1 + $0x60] sm:$0xff] }
   0x4   :  { %77 = vmatpush.msra.mxu0 %v52_v4  ;;  %106 = vmatpush.msra.mxu1 %v53_v5  ;;  %v51_v9 = vld [vmem:[%s2374_s1 + $0x68] sm:$0xff]  ;;  %v1332_v10 = vld [vmem:[%s2374_s1 + $0xf0] sm:$0xff]  ;;  %v1333_v11 = vld [vmem:[%s2374_s1 + $0xf8] sm:$0xff] }
   0x5   :  { %183 = vmatpush.msra.mxu2 %v1334_v6  ;;  %212 = vmatpush.msra.mxu3 %v1335_v7  ;;  %v48_v12 = vld [vmem:[%s2374_s1 + $0x50] sm:$0xff]  ;;  %v49_v13 = vld [vmem:[%s2374_s1 + $0x58] sm:$0xff]  ;;  %v1330_v14 = vld [vmem:[%s2374_s1 + $0xe0] sm:$0xff] }
   0x6   :  { %78 = vmatpush.msra.mxu0 %v50_v8  ;;  %107 = vmatpush.msra.mxu1 %v51_v9  ;;  %v1331_v15 = vld [vmem:[%s2374_s1 + $0xe8] sm:$0xff]  ;;  %v46_v16 = vld [vmem:[%s2374_s1 + $0x40] sm:$0xff]  ;;  %v1328_v18 = vld [vmem:[%s2374_s1 + $0xd0] sm:$0xff] }
   0x7   :  { %184 = vmatpush.msra.mxu2 %v1332_v10  ;;  %213 = vmatpush.msra.mxu3 %v1333_v11  ;;  %v47_v17 = vld [vmem:[%s2374_s1 + $0x48] sm:$0xff]  ;;  %v1329_v19 = vld [vmem:[%s2374_s1 + $0xd8] sm:$0xff]  ;;  %v44_v20 = vld [vmem:[%s2374_s1 + $0x30] sm:$0xff] }
   0x8   :  { %79 = vmatpush.msra.mxu0 %v48_v12  ;;  %108 = vmatpush.msra.mxu1 %v49_v13  ;;  %v45_v21 = vld [vmem:[%s2374_s1 + $0x38] sm:$0xff]  ;;  %v1326_v22 = vld [vmem:[%s2374_s1 + $0xc0] sm:$0xff]  ;;  %v1327_v23 = vld [vmem:[%s2374_s1 + $0xc8] sm:$0xff] }
   0x9   :  { %185 = vmatpush.msra.mxu2 %v1330_v14  ;;  %214 = vmatpush.msra.mxu3 %v1331_v15  ;;  %v42_v24 = vld [vmem:[%s2374_s1 + $0x20] sm:$0xff]  ;;  %v43_v25 = vld [vmem:[%s2374_s1 + $0x28] sm:$0xff]  ;;  %v1324_v26 = vld [vmem:[%s2374_s1 + $0xb0] sm:$0xff] }
   0xa   :  { %80 = vmatpush.msra.mxu0 %v46_v16  ;;  %109 = vmatpush.msra.mxu1 %v47_v17  ;;  %v1325_v27 = vld [vmem:[%s2374_s1 + $0xb8] sm:$0xff]  ;;  %v40_v28 = vld [vmem:[%s2374_s1 + $0x10] sm:$0xff]  ;;  %v1322_v30 = vld [vmem:[%s2374_s1 + $0xa0] sm:$0xff] }
   0xb   :  { %186 = vmatpush.msra.mxu2 %v1328_v18  ;;  %215 = vmatpush.msra.mxu3 %v1329_v19  ;;  %v41_v29 = vld [vmem:[%s2374_s1 + $0x18] sm:$0xff]  ;;  %v1323_v31 = vld [vmem:[%s2374_s1 + $0xa8] sm:$0xff]  ;;  %v38_v32 = vld [vmem:[%s2374_s1] sm:$0xff] }
   0xc   :  { %81 = vmatpush.msra.mxu0 %v44_v20  ;;  %110 = vmatpush.msra.mxu1 %v45_v21  ;;  %v39_v33 = vld [vmem:[%s2374_s1 + $0x8] sm:$0xff]  ;;  %v1320_v34 = vld [vmem:[%s2374_s1 + $0x90] sm:$0xff]  ;;  %v1321_v35 = vld [vmem:[%s2374_s1 + $0x98] sm:$0xff] }
   0xd   :  { %187 = vmatpush.msra.mxu2 %v1326_v22  ;;  %216 = vmatpush.msra.mxu3 %v1327_v23  ;;  %v34_v36 = vld [vmem:[%s2373_s0] sm:$0xff]  ;;  %v1363_v39 = vld [vmem:[%s2374_s1 + $0x1a8] sm:$0xff]  ;;  %v1360_v40 = vld [vmem:[%s2374_s1 + $0x190] sm:$0xff] }
   0xe   :  { %82 = vmatpush.msra.mxu0 %v42_v24  ;;  %111 = vmatpush.msra.mxu1 %v43_v25  ;;  %v140_v37 = vld [vmem:[%s2373_s0 + $0x1] sm:$0xff]  ;;  %v1361_v41 = vld [vmem:[%s2374_s1 + $0x198] sm:$0xff] }
   0xf   :  { %188 = vmatpush.msra.mxu2 %v1324_v26  ;;  %217 = vmatpush.msra.mxu3 %v1325_v27  ;;  %v1362_v38 = vld [vmem:[%s2374_s1 + $0x1a0] sm:$0xff]  ;;  %v1359_v43 = vld [vmem:[%s2374_s1 + $0x188] sm:$0xff] }
  0x10   :  { %83 = vmatpush.msra.mxu0 %v40_v28  ;;  %112 = vmatpush.msra.mxu1 %v41_v29  ;;  %v1358_v42 = vld [vmem:[%s2374_s1 + $0x180] sm:$0xff] }
  0x11   :  { %189 = vmatpush.msra.mxu2 %v1322_v30  ;;  %218 = vmatpush.msra.mxu3 %v1323_v31 }
  0x12   :  { %84 = vmatpush.msra.mxu0 %v38_v32  ;;  %113 = vmatpush.msra.mxu1 %v39_v33 }
  0x13   :  { %190 = vmatpush.msra.mxu2 %v1320_v34  ;;  %219 = vmatpush.msra.mxu3 %v1321_v35 }
  0x14   :  { %1312 = vmatmul.msk.f32.vlgmr.msra.gmra.mxu0 %vm56_vm0, %v34_v36  ;;  %1316 = vmatmul.msk.f32.vlgmr.msra.gmra.mxu1 %vm56_vm0, %v34_v36 }
  0x15   :  { %1338 = vmatmul.msk.f32.vlgmr.msra.gmra.mxu2 %vm56_vm0, %v140_v37  ;;  %1342 = vmatmul.msk.f32.vlgmr.msra.gmra.mxu3 %vm56_vm0, %v140_v37 }
  0x16   :  { %283 = vmatpush.msrb.mxu0 %v1362_v38  ;;  %312 = vmatpush.msrb.mxu1 %v1363_v39 }
  0x17   :  { %14 = vsyncpa [#allocation5], 0  ;;  %v35_v44 = vld [vmem:[%s2373_s0 + $0x8] sm:$0xff]  ;;  %v1356_v46 = vld [vmem:[%s2374_s1 + $0x170] sm:$0xff]  ;;  %v350_v26 = vlaneseq  ;;  %v1517_v32 = vmov 0.0   ;;  %vm399_vm2 = vcmask 130049  }
  0x18   :  { %284 = vmatpush.msrb.mxu0 %v1360_v40  ;;  %313 = vmatpush.msrb.mxu1 %v1361_v41  ;;  %v141_v45 = vld [vmem:[%s2373_s0 + $0x9] sm:$0xff]  ;;  %v1357_v47 = vld [vmem:[%s2374_s1 + $0x178] sm:$0xff]  ;;  %v1354_v48 = vld [vmem:[%s2374_s1 + $0x160] sm:$0xff]  ;;  %vm373_vm3 = vcmask 1040384   ;;  %vm402_vm4 = vcmask 130048   ;;  %vm405_vm5 = vcmask 122880  }
  0x19   :  { %v1355_v49 = vld [vmem:[%s2374_s1 + $0x168] sm:$0xff]  ;;  %v1352_v50 = vld [vmem:[%s2374_s1 + $0x150] sm:$0xff]  ;;  %v1353_v51 = vld [vmem:[%s2374_s1 + $0x158] sm:$0xff]  ;;  %vm352_vm1 = vcmp.lt.s32.totalorder %v350_v26, 144  ;;  %vm541_vm6 = vcmask 1046528   ;;  %vm671_vm7 = vcmask 1045504  }
  0x1a   :  { %285 = vmatpush.msrb.mxu0 %v1358_v42  ;;  %314 = vmatpush.msrb.mxu1 %v1359_v43  ;;  %v36_v52 = vld [vmem:[%s2373_s0 + $0x18] sm:$0xff]  ;;  %v1350_v54 = vld [vmem:[%s2374_s1 + $0x140] sm:$0xff]  ;;  %v1351_v55 = vld [vmem:[%s2374_s1 + $0x148] sm:$0xff]  ;;  %354 = vst.msk [vmem:[#allocation2] ss:$8 sm:$0x3] %vm352_vm1, %v1517_v32 }
  0x1b   :  { %v142_v53 = vld [vmem:[%s2373_s0 + $0x19] sm:$0xff]  ;;  %v1348_v56 = vld [vmem:[%s2374_s1 + $0x130] sm:$0xff]  ;;  %v1347_v59 = vld [vmem:[%s2374_s1 + $0x128] sm:$0xff]  ;;  %357 = vst.msk [vmem:[#allocation2 + $0x30] ss:$8 sm:$0x3] %vm352_vm1, %v1517_v32 }
  0x1c   :  { %1313 = vmatmul.msk.f32.gmra.mxu0 %vm56_vm0, %v35_v44  ;;  %1317 = vmatmul.msk.f32.gmra.mxu1 %vm56_vm0, %v35_v44  ;;  %v1349_v57 = vld [vmem:[%s2374_s1 + $0x138] sm:$0xff]  ;;  %v1346_v58 = vld [vmem:[%s2374_s1 + $0x120] sm:$0xff]  ;;  %v242_v63 = vld [vmem:[%s2373_s0 + $0xa] sm:$0xff]  ;;  %360 = vst.msk [vmem:[#allocation2 + $0x21] ss:$8 sm:$0x3] %vm352_vm1, %v1517_v32 }
  0x1d   :  { %1339 = vmatmul.msk.f32.gmra.mxu2 %vm56_vm0, %v141_v45  ;;  %1343 = vmatmul.msk.f32.gmra.mxu3 %vm56_vm0, %v141_v45  ;;  %v37_v60 = vld [vmem:[%s2373_s0 + $0x20] sm:$0xff]  ;;  %v437_v2 = vld [vmem:[%s2376_s3 + $0x78] sm:$0xff]  ;;  %v439_v3 = vld [vmem:[%s2376_s3 + $0x88] sm:$0xff]  ;;  %363 = vst.msk [vmem:[#allocation2 + $0x51] ss:$8 sm:$0x3] %vm352_vm1, %v1517_v32 }
  0x1e   :  { %286 = vmatpush.msrb.mxu0 %v1356_v46  ;;  %315 = vmatpush.msrb.mxu1 %v1357_v47  ;;  %v143_v61 = vld [vmem:[%s2373_s0 + $0x21] sm:$0xff]  ;;  %v436_v4 = vld [vmem:[%s2376_s3 + $0x70] sm:$0xff]  ;;  %v433_v9 = vld [vmem:[%s2376_s3 + $0x58] sm:$0xff]  ;;  %vm861_vm8 = vcmask 1041409   ;;  %vm863_vm9 = vcmask 523264   ;;  %vm1270_vm10 = vcmask 261120  }
  0x1f   :  { %v241_v62 = vld [vmem:[%s2373_s0 + $0x2] sm:$0xff]  ;;  %v243_v0 = vld [vmem:[%s2373_s0 + $0x1a] sm:$0xff]  ;;  %452 = vmatpush.msrb.mxu2 %v437_v2  ;;  %495 = vmatpush.msrb.mxu3 %v439_v3  ;;  %v432_v11 = vld [vmem:[%s2376_s3 + $0x50] sm:$0xff]  ;;  %s1519_s15 = smov [#allocation4]   ;;  %s1303_s19 = sshll.u32 %s2382_s9, 4  ;;  %vm1294_vm11 = vcmask 74752   ;;  %s1304_s19 = int_to_ptr.hbm [resolvable:$true] %s1303_s19 }
  0x20   :  { %287 = vmatpush.msrb.mxu0 %v1354_v48  ;;  %316 = vmatpush.msrb.mxu1 %v1355_v49  ;;  %v244_v1 = vld [vmem:[%s2373_s0 + $0x22] sm:$0xff]  ;;  %v1389_v10 = vld [vmem:[%s2376_s3 + $0xf8] sm:$0xff]  ;;  %v1388_v13 = vld [vmem:[%s2376_s3 + $0xf0] sm:$0xff]  ;;  %s1301_s16 = sshll.u32 %s1519_s15, 4  ;;  %s1302_s16 = int_to_ptr.vmem [resolvable:$true] %s1301_s16 }
  0x21   :  { %v435_v5 = vld [vmem:[%s2376_s3 + $0x68] sm:$0xff]  ;;  %453 = vmatpush.msrb.mxu2 %v436_v4  ;;  %v434_v7 = vld [vmem:[%s2376_s3 + $0x60] sm:$0xff]  ;;  %v429_v19 = vld [vmem:[%s2376_s3 + $0x38] sm:$0xff] }
  0x22   :  { %288 = vmatpush.msrb.mxu0 %v1352_v50  ;;  %317 = vmatpush.msrb.mxu1 %v1353_v51  ;;  %v1391_v6 = vld [vmem:[%s2376_s3 + $0x108] sm:$0xff]  ;;  %v1390_v8 = vld [vmem:[%s2376_s3 + $0x100] sm:$0xff]  ;;  %v428_v20 = vld [vmem:[%s2376_s3 + $0x30] sm:$0xff] }
  0x23   :  { %454 = vmatpush.msrb.mxu2 %v435_v5  ;;  %v431_v12 = vld [vmem:[%s2376_s3 + $0x48] sm:$0xff]  ;;  %v430_v15 = vld [vmem:[%s2376_s3 + $0x40] sm:$0xff]  ;;  %v1385_v21 = vld [vmem:[%s2376_s3 + $0xd8] sm:$0xff] }
  0x24   :  { %1314 = vmatmul.msk.f32.gmra.mxu0 %vm56_vm0, %v36_v52  ;;  %1318 = vmatmul.msk.f32.gmra.mxu1 %vm56_vm0, %v36_v52  ;;  %v1387_v14 = vld [vmem:[%s2376_s3 + $0xe8] sm:$0xff]  ;;  %v1386_v16 = vld [vmem:[%s2376_s3 + $0xe0] sm:$0xff]  ;;  %v1384_v23 = vld [vmem:[%s2376_s3 + $0xd0] sm:$0xff] }
  0x25   :  { %1340 = vmatmul.msk.f32.gmra.mxu2 %vm56_vm0, %v142_v53  ;;  %1344 = vmatmul.msk.f32.gmra.mxu3 %vm56_vm0, %v142_v53  ;;  %v427_v22 = vld [vmem:[%s2376_s3 + $0x28] sm:$0xff]  ;;  %v426_v24 = vld [vmem:[%s2376_s3 + $0x20] sm:$0xff]  ;;  %v425_v31 = vld [vmem:[%s2376_s3 + $0x18] sm:$0xff] }
  0x26   :  { %289 = vmatpush.msrb.mxu0 %v1350_v54  ;;  %318 = vmatpush.msrb.mxu1 %v1351_v55  ;;  %v1383_v25 = vld [vmem:[%s2376_s3 + $0xc8] sm:$0xff]  ;;  %v438_v29 = vld [vmem:[%s2376_s3 + $0x80] sm:$0xff]  ;;  %v1381_v33 = vld [vmem:[%s2376_s3 + $0xb8] sm:$0xff] }
  0x27   :  { %455 = vmatpush.msrb.mxu2 %v434_v7  ;;  %v1382_v30 = vld [vmem:[%s2376_s3 + $0xc0] sm:$0xff]  ;;  %496 = vmatpush.msrb.mxu3 %v438_v29  ;;  %v424_v34 = vld [vmem:[%s2376_s3 + $0x10] sm:$0xff]  ;;  %v423_v36 = vld [vmem:[%s2376_s3 + $0x8] sm:$0xff] }
  0x28   :  { %290 = vmatpush.msrb.mxu0 %v1348_v56  ;;  %319 = vmatpush.msrb.mxu1 %v1349_v57  ;;  %v1380_v35 = vld [vmem:[%s2376_s3 + $0xb0] sm:$0xff]  ;;  %v1379_v37 = vld [vmem:[%s2376_s3 + $0xa8] sm:$0xff]  ;;  %v422_v40 = vld [vmem:[%s2376_s3] sm:$0xff] }
  0x29   :  { %456 = vmatpush.msrb.mxu2 %v433_v9  ;;  %v1378_v41 = vld [vmem:[%s2376_s3 + $0xa0] sm:$0xff]  ;;  %v1413_v42 = vld [vmem:[%s2376_s3 + $0x198] sm:$0xff]  ;;  %v1412_v44 = vld [vmem:[%s2376_s3 + $0x190] sm:$0xff] }
  0x2a   :  { %291 = vmatpush.msrb.mxu0 %v1346_v58  ;;  %320 = vmatpush.msrb.mxu1 %v1347_v59  ;;  %v1377_v43 = vld [vmem:[%s2376_s3 + $0x98] sm:$0xff]  ;;  %v1376_v45 = vld [vmem:[%s2376_s3 + $0x90] sm:$0xff]  ;;  %v33_v48 = vld [vmem:[%s2375_s2] sm:$0x3] }
  0x2b   :  { %457 = vmatpush.msrb.mxu2 %v432_v11  ;;  %v1411_v49 = vld [vmem:[%s2376_s3 + $0x188] sm:$0xff]  ;;  %v1393_v53 = vld [vmem:[%s2376_s3 + $0x118] sm:$0xff]  ;;  %v1410_v54 = vld [vmem:[%s2376_s3 + $0x180] sm:$0xff]  ;;  %v1931_v55 = vperm.slane %v33_v48, 0  ;;  %v1933_v56 = vperm.slane %v33_v48, 1 }
  0x2c   :  { %1315 = vmatmul.msk.f32.gmra.mxu0 %vm56_vm0, %v37_v60  ;;  %1319 = vmatmul.msk.f32.gmra.mxu1 %vm56_vm0, %v37_v60  ;;  %v1415_v52 = vld [vmem:[%s2376_s3 + $0x1a8] sm:$0xff]  ;;  %v1409_v57 = vld [vmem:[%s2376_s3 + $0x178] sm:$0xff]  ;;  %v1392_v58 = vld [vmem:[%s2376_s3 + $0x110] sm:$0xff] }
  0x2d   :  { %1341 = vmatmul.msk.f32.gmra.mxu2 %vm56_vm0, %v143_v61  ;;  %1345 = vmatmul.msk.f32.gmra.mxu3 %vm56_vm0, %v143_v61  ;;  %v1408_v59 = vld [vmem:[%s2376_s3 + $0x170] sm:$0xff]  ;;  %v1406_v5 = vld [vmem:[%s2376_s3 + $0x160] sm:$0xff] }
  0x2e   :  { %593 = vmatpush.msra.mxu0 %v1391_v6  ;;  %458 = vmatpush.msrb.mxu2 %v431_v12  ;;  %v1414_v9 = vld [vmem:[%s2376_s3 + $0x1a0] sm:$0xff]  ;;  %v1404_v12 = vld [vmem:[%s2376_s3 + $0x150] sm:$0xff] }
  0x2f   :  { %766 = vmatpush.msra.mxu3 %v1415_v52  ;;  %636 = vmatpush.msra.mxu1 %v1393_v53 }
  0x30   :  { %594 = vmatpush.msra.mxu0 %v1390_v8  ;;  %459 = vmatpush.msrb.mxu2 %v430_v15  ;;  %v1405_v8 = vld [vmem:[%s2376_s3 + $0x158] sm:$0xff] }
  0x31   :  { %637 = vmatpush.msra.mxu1 %v1392_v58  ;;  %767 = vmatpush.msra.mxu3 %v1414_v9 }
  0x32   :  { %595 = vmatpush.msra.mxu0 %v1389_v10  ;;  %460 = vmatpush.msrb.mxu2 %v429_v19 }
  0x34   :  { %1364 = vmatmul.msk.f32.vlgmr.msrb.gmra.mxu0 %vm56_vm0, %v241_v62  ;;  %1368 = vmatmul.msk.f32.vlgmr.msrb.gmra.mxu1 %vm56_vm0, %v241_v62  ;;  %v1407_v62 = vld [vmem:[%s2376_s3 + $0x168] sm:$0xff] }
  0x35   :  { %596 = vmatpush.msra.mxu0 %v1388_v13  ;;  %461 = vmatpush.msrb.mxu2 %v428_v20  ;;  %v1402_v20 = vld [vmem:[%s2376_s3 + $0x140] sm:$0xff] }
  0x37   :  { %597 = vmatpush.msra.mxu0 %v1387_v14  ;;  %462 = vmatpush.msrb.mxu2 %v427_v22 }
  0x39   :  { %598 = vmatpush.msra.mxu0 %v1386_v16  ;;  %463 = vmatpush.msrb.mxu2 %v426_v24 }
  0x3b   :  { %599 = vmatpush.msra.mxu0 %v1385_v21  ;;  %464 = vmatpush.msrb.mxu2 %v425_v31 }
  0x3c   :  { %1365 = vmatmul.msk.f32.gmra.mxu0 %vm56_vm0, %v242_v63  ;;  %1369 = vmatmul.msk.f32.gmra.mxu1 %vm56_vm0, %v242_v63 }
  0x3d   :  { %600 = vmatpush.msra.mxu0 %v1384_v23  ;;  %465 = vmatpush.msrb.mxu2 %v424_v34 }
  0x3f   :  { %601 = vmatpush.msra.mxu0 %v1383_v25  ;;  %466 = vmatpush.msrb.mxu2 %v423_v36  ;;  %v1401_v25 = vld [vmem:[%s2376_s3 + $0x138] sm:$0xff] }
  0x41   :  { %602 = vmatpush.msra.mxu0 %v1382_v30  ;;  %467 = vmatpush.msrb.mxu2 %v422_v40  ;;  %v1400_v30 = vld [vmem:[%s2376_s3 + $0x130] sm:$0xff] }
  0x43   :  { %603 = vmatpush.msra.mxu0 %v1381_v33  ;;  %723 = vmatpush.msra.mxu2 %v1413_v42 }
  0x44   :  { %1366 = vmatmul.msk.f32.gmra.mxu0 %vm56_vm0, %v243_v0  ;;  %1370 = vmatmul.msk.f32.gmra.mxu1 %vm56_vm0, %v243_v0 }
  0x45   :  { %604 = vmatpush.msra.mxu0 %v1380_v35  ;;  %724 = vmatpush.msra.mxu2 %v1412_v44  ;;  %v1399_v35 = vld [vmem:[%s2376_s3 + $0x128] sm:$0xff]  ;;  %v1398_v44 = vld [vmem:[%s2376_s3 + $0x120] sm:$0xff] }
  0x47   :  { %605 = vmatpush.msra.mxu0 %v1379_v37  ;;  %725 = vmatpush.msra.mxu2 %v1411_v49 }
  0x49   :  { %606 = vmatpush.msra.mxu0 %v1378_v41  ;;  %726 = vmatpush.msra.mxu2 %v1410_v54 }
  0x4b   :  { %607 = vmatpush.msra.mxu0 %v1377_v43  ;;  %727 = vmatpush.msra.mxu2 %v1409_v57 }
  0x4c   :  { %1367 = vmatmul.msk.f32.gmra.mxu0 %vm56_vm0, %v244_v1  ;;  %1371 = vmatmul.msk.f32.gmra.mxu1 %vm56_vm0, %v244_v1 }
  0x4d   :  { %608 = vmatpush.msra.mxu0 %v1376_v45  ;;  %728 = vmatpush.msra.mxu2 %v1408_v59 }
  0x4f   :  { %729 = vmatpush.msra.mxu2 %v1407_v62 }
  0x51   :  { %730 = vmatpush.msra.mxu2 %v1406_v5 }
  0x53   :  { %731 = vmatpush.msra.mxu2 %v1405_v8 }
  0x55   :  { %732 = vmatpush.msra.mxu2 %v1404_v12 }
  0x91   :  { %v1837_v17 = vpop.f32.mrf.mxu0  ;;  %v1839_v18 = vpop.f32.mrf.mxu1 }
  0x92   :  { %v132_v60 = vadd.f32 %v1931_v55, %v1837_v17  ;;  %v133_v61 = vadd.f32 %v1933_v56, %v1839_v18  ;;  %v1403_v17 = vld [vmem:[%s2376_s3 + $0x148] sm:$0xff] }
  0x93   :  { %733 = vmatpush.msra.mxu2 %v1403_v17 }
  0x95   :  { %734 = vmatpush.msra.mxu2 %v1402_v20 }
  0x97   :  { %735 = vmatpush.msra.mxu2 %v1401_v25 }
  0x98   :  { %v192_v46 = vpop.f32.mrf.mxu2  ;;  %v221_v47 = vpop.f32.mrf.mxu3 }
  0x99   :  { %v1862_v27 = vpop.f32.mrf.mxu0  ;;  %v1864_v28 = vpop.f32.mrf.mxu1  ;;  %v233_v63 = vadd.f32 %v192_v46, %v132_v60  ;;  %v234_v0 = vadd.f32 %v221_v47, %v133_v61  ;;  %736 = vmatpush.msra.mxu2 %v1400_v30 }
  0x9a   :  { %v134_v13 = vadd.f32 %v1931_v55, %v1862_v27  ;;  %v135_v14 = vadd.f32 %v1933_v56, %v1864_v28 }
  0x9b   :  { %737 = vmatpush.msra.mxu2 %v1399_v35 }
  0x9d   :  { %738 = vmatpush.msra.mxu2 %v1398_v44 }
  0xa0   :  { %v195_v1 = vpop.f32.mrf.mxu2  ;;  %v224_v2 = vpop.f32.mrf.mxu3 }
  0xa1   :  { %v1890_v38 = vpop.f32.mrf.mxu0  ;;  %v1892_v39 = vpop.f32.mrf.mxu1  ;;  %v235_v18 = vadd.f32 %v195_v1, %v134_v13  ;;  %v236_v19 = vadd.f32 %v224_v2, %v135_v14 }
  0xa2   :  { %v136_v31 = vadd.f32 %v1931_v55, %v1890_v38  ;;  %v137_v32 = vadd.f32 %v1933_v56, %v1892_v39 }
  0xa8   :  { %v198_v26 = vpop.f32.mrf.mxu2  ;;  %v227_v27 = vpop.f32.mrf.mxu3 }
  0xa9   :  { %v1918_v50 = vpop.f32.mrf.mxu0  ;;  %v1920_v51 = vpop.f32.mrf.mxu1  ;;  %v237_v36 = vadd.f32 %v198_v26, %v136_v31  ;;  %v238_v41 = vadd.f32 %v227_v27, %v137_v32 }
  0xaa   :  { %v138_v59 = vadd.f32 %v1931_v55, %v1918_v50  ;;  %v139_v60 = vadd.f32 %v1933_v56, %v1920_v51 }
  0xb0   :  { %v201_v57 = vpop.f32.mrf.mxu2  ;;  %v230_v58 = vpop.f32.mrf.mxu3 }
  0xb1   :  { %v293_v3 = vpop.f32.mrf.mxu0  ;;  %v322_v4 = vpop.f32.mrf.mxu1  ;;  %v239_v1 = vadd.f32 %v201_v57, %v138_v59  ;;  %v240_v2 = vadd.f32 %v230_v58, %v139_v60 }
  0xb2   :  { %v334_v6 = vadd.f32 %v293_v3, %v233_v63  ;;  %v335_v7 = vadd.f32 %v322_v4, %v234_v0 }
  0xb4   :  { %v342_v10 = vmax.f32 %v334_v6, 0.0  ;;  %v343_v11 = vmax.f32 %v335_v7, 0.0 }
  0xb6   :  { %v374_v15 = vrot.slane %v342_v10, 7  ;;  %v375_v16 = vrot.slane %v343_v11, 7 }
  0xb8   :  { %398 = vst [vmem:[#allocation2] sm:$0xfe] %v374_v15 }
  0xb9   :  { %400 = vst.msk [vmem:[#allocation2 + $0x8] sm:$0xfe] %vm399_vm2, %v375_v16  ;;  %v296_v21 = vpop.f32.mrf.mxu0  ;;  %v325_v22 = vpop.f32.mrf.mxu1 }
  0xba   :  { %v336_v23 = vadd.f32 %v296_v21, %v235_v18  ;;  %v337_v24 = vadd.f32 %v325_v22, %v236_v19 }
  0xbc   :  { %v344_v28 = vmax.f32 %v336_v23, 0.0  ;;  %v345_v29 = vmax.f32 %v337_v24, 0.0 }
  0xbe   :  { %v376_v33 = vrot.slane %v344_v28, 7  ;;  %v378_v34 = vrot.slane %v345_v29, 7 }
  0xbf   :  { %v414_v37 = vld [vmem:[#allocation2] sm:$0xff] }
  0xc0   :  { %v517_v40 = vld [vmem:[#allocation2] sm:$0xfe]  ;;  %v1988_v38 = vsel %vm373_vm3, %v374_v15, %v376_v33  ;;  %404 = vst [vmem:[#allocation2 + $0x20] sm:$0x1] %v376_v33  ;;  %v379_v39 = vsel %vm373_vm3, %v375_v16, %v378_v34  ;;  %468 = vmatmul.f32.vlgmr.msrb.gmra.mxu2 %v414_v37  ;;  %v415_v42 = vld [vmem:[#allocation2 + $0x8] sm:$0xff] }
  0xc1   :  { %v542_v43 = vrot.slane %v517_v40, 1  ;;  %1372 = vmatmul.msk.f32.vlgmr.msrb.gmra.mxu3 %vm402_vm4, %v415_v42  ;;  %v299_v45 = vpop.f32.mrf.mxu0  ;;  %v328_v46 = vpop.f32.mrf.mxu1  ;;  %v543_v47 = vrot.slane %v1988_v38, 1  ;;  %403 = vst.msk [vmem:[#allocation2 + $0x18] sm:$0xff] %vm402_vm4, %v379_v39  ;;  %v518_v63 = vld [vmem:[#allocation2 + $0x8] sm:$0xfe]  ;;  %v673_v33 = vrot.slane %v1988_v38, 2 }
  0xc2   :  { %v338_v48 = vadd.f32 %v299_v45, %v237_v36  ;;  %v339_v49 = vadd.f32 %v328_v46, %v238_v41  ;;  %406 = vst.msk [vmem:[#allocation2 + $0x28] sm:$0x1] %vm405_vm5, %v378_v34  ;;  %v545_v50 = vrot.slane %v518_v63, 1  ;;  %v655_v26 = vld [vmem:[#allocation2] sm:$0xfc] }
  0xc3   :  { %v544_v52 = vsel %vm541_vm6, %v542_v43, %v543_v47  ;;  %v672_v32 = vrot.slane %v655_v26, 2  ;;  %v656_v35 = vld [vmem:[#allocation2 + $0x8] sm:$0xfc] }
  0xc4   :  { %v346_v53 = vmax.f32 %v338_v48, 0.0  ;;  %v347_v54 = vmax.f32 %v339_v49, 0.0  ;;  %609 = vmatmul.f32.vlgmr.msra.gmra.mxu0 %v544_v52  ;;  %v675_v41 = vrot.slane %v656_v35, 2 }
  0xc5   :  { %v674_v40 = vsel %vm671_vm7, %v672_v32, %v673_v33 }
  0xc6   :  { %v380_v61 = vrot.slane %v346_v53, 7  ;;  %v381_v62 = vrot.slane %v347_v54, 7 }
  0xc7   :  { %v521_v0 = vld [vmem:[#allocation2 + $0x20] sm:$0x1] }
  0xc8   :  { %407 = vst [vmem:[#allocation2 + $0x30] sm:$0xfe] %v380_v61  ;;  %471 = vmatmul.f32.gmra.mxu2 %v1988_v38  ;;  %v548_v3 = vrot.slane %v521_v0, 1  ;;  %v2005_v6 = vld [vmem:[#allocation2 + $0x18] sm:$0xff]  ;;  %v657_v42 = vld [vmem:[#allocation2 + $0x20] sm:$0x3] }
  0xc9   :  { %408 = vst.msk [vmem:[#allocation2 + $0x38] sm:$0xfe] %vm399_vm2, %v381_v62  ;;  %v302_v4 = vpop.f32.mrf.mxu0  ;;  %v331_v5 = vpop.f32.mrf.mxu1  ;;  %1373 = vmatmul.msk.f32.gmra.mxu3 %vm402_vm4, %v2005_v6  ;;  %v546_v51 = vrot.slane %v2005_v6, 1  ;;  %v522_v11 = vld [vmem:[#allocation2 + $0x28] sm:$0x1]  ;;  %v676_v36 = vrot.slane %v2005_v6, 2 }
  0xca   :  { %v340_v55 = vadd.f32 %v302_v4, %v239_v1  ;;  %v341_v7 = vadd.f32 %v331_v5, %v240_v2  ;;  %v549_v56 = vsel %vm541_vm6, %v543_v47, %v548_v3  ;;  %v550_v19 = vrot.slane %v522_v11, 1  ;;  %v658_v38 = vld [vmem:[#allocation2 + $0x28] sm:$0x3] }
  0xcb   :  { %v547_v10 = vsel %vm541_vm6, %v545_v50, %v546_v51  ;;  %v677_v43 = vsel %vm671_vm7, %v675_v41, %v676_v36  ;;  %v678_v44 = vrot.slane %v657_v42, 2  ;;  %v680_v46 = vrot.slane %v658_v38, 2 }
  0xcc   :  { %v348_v8 = vmax.f32 %v340_v55, 0.0  ;;  %v349_v9 = vmax.f32 %v341_v7, 0.0  ;;  %612 = vmatmul.f32.gmra.mxu0 %v549_v56  ;;  %1394 = vmatmul.msk.f32.vlgmr.msra.gmra.mxu1 %vm402_vm4, %v547_v10  ;;  %v551_v23 = vsel %vm541_vm6, %v546_v51, %v550_v19  ;;  %v2049_v10 = vld [vmem:[%s2377_s4] ss:$0 sm:$0xff]  ;;  %s1518_s4 = smov 64  }
  0xcd   :  { %v679_v47 = vsel %vm671_vm7, %v673_v33, %v678_v44  ;;  %v681_v49 = vsel %vm671_vm7, %v676_v36, %v680_v46 }
  0xce   :  { %v382_v12 = vrot.slane %v348_v8, 7  ;;  %v384_v13 = vrot.slane %v349_v9, 7 }
  0xcf   :  { %v418_v14 = vld [vmem:[#allocation2 + $0x30] sm:$0xff] }
  0xd0   :  { %v523_v15 = vld [vmem:[#allocation2 + $0x30] sm:$0xfe]  ;;  %v2014_v16 = vsel %vm373_vm3, %v380_v61, %v382_v12  ;;  %411 = vst [vmem:[#allocation2 + $0x50] sm:$0x1] %v382_v12  ;;  %v385_v17 = vsel %vm373_vm3, %v381_v62, %v384_v13  ;;  %474 = vmatmul.f32.gmra.mxu2 %v418_v14  ;;  %v419_v18 = vld [vmem:[#allocation2 + $0x38] sm:$0xff] }
  0xd1   :  { %v552_v20 = vrot.slane %v523_v15, 1  ;;  %v553_v21 = vrot.slane %v2014_v16, 1  ;;  %410 = vst.msk [vmem:[#allocation2 + $0x48] sm:$0xff] %vm402_vm4, %v385_v17  ;;  %1374 = vmatmul.msk.f32.gmra.mxu3 %vm402_vm4, %v419_v18  ;;  %v524_v24 = vld [vmem:[#allocation2 + $0x38] sm:$0xfe]  ;;  %v683_v53 = vrot.slane %v2014_v16, 2 }
  0xd2   :  { %412 = vst.msk [vmem:[#allocation2 + $0x58] sm:$0x1] %vm405_vm5, %v384_v13  ;;  %v555_v29 = vrot.slane %v524_v24, 1  ;;  %v659_v48 = vld [vmem:[#allocation2 + $0x30] sm:$0xfc] }
  0xd3   :  { %v554_v22 = vsel %vm541_vm6, %v552_v20, %v553_v21  ;;  %v682_v52 = vrot.slane %v659_v48, 2  ;;  %v660_v54 = vld [vmem:[#allocation2 + $0x38] sm:$0xfc] }
  0xd4   :  { %615 = vmatmul.f32.gmra.mxu0 %v554_v22  ;;  %1395 = vmatmul.msk.f32.gmra.mxu1 %vm402_vm4, %v551_v23  ;;  %v685_v59 = vrot.slane %v660_v54, 2 }
  0xd5   :  { %v684_v58 = vsel %vm671_vm7, %v682_v52, %v683_v53 }
  0xd7   :  { %v527_v25 = vld [vmem:[#allocation2 + $0x50] sm:$0x1] }
  0xd8   :  { %477 = vmatmul.f32.gmra.mxu2 %v2014_v16  ;;  %v558_v27 = vrot.slane %v527_v25, 1  ;;  %v421_v28 = vld [vmem:[#allocation2 + $0x48] sm:$0xff]  ;;  %v661_v60 = vld [vmem:[#allocation2 + $0x50] sm:$0x3] }
  0xd9   :  { %1375 = vmatmul.msk.f32.gmra.mxu3 %vm402_vm4, %v421_v28  ;;  %v556_v30 = vrot.slane %v421_v28, 1  ;;  %v528_v37 = vld [vmem:[#allocation2 + $0x58] sm:$0x1]  ;;  %v686_v57 = vrot.slane %v421_v28, 2  ;;  %v688_v63 = vrot.slane %v661_v60, 2 }
  0xda   :  { %v559_v31 = vsel %vm541_vm6, %v553_v21, %v558_v27  ;;  %v560_v39 = vrot.slane %v528_v37, 1  ;;  %v662_v62 = vld [vmem:[#allocation2 + $0x58] sm:$0x3] }
  0xdb   :  { %v557_v34 = vsel %vm541_vm6, %v555_v29, %v556_v30  ;;  %v687_v61 = vsel %vm671_vm7, %v685_v59, %v686_v57  ;;  %v690_v0 = vrot.slane %v662_v62, 2  ;;  %v689_v1 = vsel %vm671_vm7, %v683_v53, %v688_v63 }
  0xdc   :  { %618 = vmatmul.f32.gmra.mxu0 %v559_v31  ;;  %1396 = vmatmul.msk.f32.gmra.mxu1 %vm402_vm4, %v557_v34  ;;  %v561_v45 = vsel %vm541_vm6, %v556_v30, %v560_v39 }
  0xdd   :  { %v691_v2 = vsel %vm671_vm7, %v686_v57, %v690_v0 }
  0xe0   :  { %739 = vmatmul.f32.vlgmr.msra.gmra.mxu2 %v674_v40 }
  0xe1   :  { %1416 = vmatmul.msk.f32.vlgmr.msra.gmra.mxu3 %vm402_vm4, %v677_v43 }
  0xe4   :  { %1397 = vmatmul.msk.f32.gmra.mxu1 %vm402_vm4, %v561_v45 }
  0xe8   :  { %742 = vmatmul.f32.gmra.mxu2 %v679_v47 }
  0xe9   :  { %1417 = vmatmul.msk.f32.gmra.mxu3 %vm402_vm4, %v681_v49 }
  0xf0   :  { %745 = vmatmul.f32.gmra.mxu2 %v684_v58 }
  0xf1   :  { %1418 = vmatmul.msk.f32.gmra.mxu3 %vm402_vm4, %v687_v61 }
  0xf8   :  { %748 = vmatmul.f32.gmra.mxu2 %v689_v1 }
  0xf9   :  { %1419 = vmatmul.msk.f32.gmra.mxu3 %vm402_vm4, %v691_v2 }
 0x141   :  { %v610_v51 = vpop.f32.mrf.mxu0 }
 0x143   :  { %v469_v3 = vpop.f32.mrf.mxu2 }
 0x144   :  { %v498_v4 = vpop.f32.mrf.mxu3 }
 0x145   :  { %v499_v9 = vadd.f32 %v498_v4, %v469_v3 }
 0x147   :  { %v513_v14 = vadd.f32 %v2049_v10, %v499_v9 }
 0x149   :  { %v639_v7 = vpop.f32.mrf.mxu1  ;;  %v613_v15 = vpop.f32.mrf.mxu0 }
 0x14a   :  { %v640_v11 = vadd.f32 %v639_v7, %v610_v51 }
 0x14b   :  { %v472_v5 = vpop.f32.mrf.mxu2 }
 0x14c   :  { %v501_v6 = vpop.f32.mrf.mxu3  ;;  %v651_v17 = vadd.f32 %v640_v11, %v513_v14 }
 0x14d   :  { %v502_v19 = vadd.f32 %v501_v6, %v472_v5 }
 0x14f   :  { %v514_v24 = vadd.f32 %v2049_v10, %v502_v19 }
 0x151   :  { %v642_v12 = vpop.f32.mrf.mxu1  ;;  %v616_v33 = vpop.f32.mrf.mxu0 }
 0x152   :  { %v643_v21 = vadd.f32 %v642_v12, %v613_v15 }
 0x153   :  { %v475_v50 = vpop.f32.mrf.mxu2 }
 0x154   :  { %v504_v55 = vpop.f32.mrf.mxu3  ;;  %v652_v30 = vadd.f32 %v643_v21, %v514_v24 }
 0x155   :  { %v505_v32 = vadd.f32 %v504_v55, %v475_v50 }
 0x157   :  { %v515_v37 = vadd.f32 %v2049_v10, %v505_v32 }
 0x159   :  { %v645_v28 = vpop.f32.mrf.mxu1  ;;  %v619_v61 = vpop.f32.mrf.mxu0 }
 0x15a   :  { %v646_v35 = vadd.f32 %v645_v28, %v616_v33 }
 0x15b   :  { %v478_v56 = vpop.f32.mrf.mxu2 }
 0x15c   :  { %v507_v8 = vpop.f32.mrf.mxu3  ;;  %v653_v46 = vadd.f32 %v646_v35, %v515_v37 }
 0x15d   :  { %v508_v58 = vadd.f32 %v507_v8, %v478_v56 }
 0x15f   :  { %v516_v3 = vadd.f32 %v2049_v10, %v508_v58  ;;  %v1445_v58 = vld [vmem:[%s2378_s5 + $0xf0] sm:$0xff] }
 0x161   :  { %v648_v52 = vpop.f32.mrf.mxu1 }
 0x162   :  { %v649_v62 = vadd.f32 %v648_v52, %v619_v61  ;;  %v1427_v52 = vld [vmem:[%s2378_s5 + $0x70] sm:$0xff]  ;;  %v1444_v61 = vld [vmem:[%s2378_s5 + $0xe8] sm:$0xff] }
 0x163   :  { %v740_v13 = vpop.f32.mrf.mxu2 }
 0x164   :  { %v769_v16 = vpop.f32.mrf.mxu3  ;;  %v654_v55 = vadd.f32 %v649_v62, %v516_v3  ;;  %v857_v62 = vld [vmem:[%s2378_s5 + $0x38] sm:$0xff]  ;;  %v1423_v3 = vld [vmem:[%s2378_s5 + $0x50] sm:$0xff] }
 0x165   :  { %v770_v18 = vadd.f32 %v769_v16, %v740_v13  ;;  %874 = vmatpush.msrb.mxu0 %v857_v62  ;;  %v1464_v62 = vld [vmem:[%s2378_s5 + $0x178] sm:$0xff] }
 0x167   :  { %v781_v20 = vadd.f32 %v770_v18, %v651_v17 }
 0x169   :  { %v785_v22 = vmax.f32 %v781_v20, 0.0 }
 0x16b   :  { %v743_v23 = vpop.f32.mrf.mxu2  ;;  %v793_v25 = vrot.slane %v785_v22, 2  ;;  %v794_v26 = vrot.slane %v785_v22, 4  ;;  %v795_v27 = vrot.slane %v785_v22, 6  ;;  %817 = vst [vmem:[#allocation3] sm:$0x3] %v785_v22 }
 0x16c   :  { %v772_v29 = vpop.f32.mrf.mxu3 }
 0x16d   :  { %818 = vst [vmem:[#allocation3 + $0x2] sm:$0x3] %v793_v25  ;;  %v773_v31 = vadd.f32 %v772_v29, %v743_v23 }
 0x16e   :  { %819 = vst [vmem:[#allocation3 + $0x4] sm:$0x3] %v794_v26 }
 0x16f   :  { %820 = vst [vmem:[#allocation3 + $0x6] sm:$0x3] %v795_v27  ;;  %v782_v34 = vadd.f32 %v773_v31, %v652_v30 }
 0x171   :  { %v786_v36 = vmax.f32 %v782_v34, 0.0 }
 0x172   :  { %v834_v41 = vld [vmem:[#allocation3] sm:$0x1]  ;;  %v836_v39 = vld [vmem:[#allocation3 + $0x1] sm:$0x1] }
 0x173   :  { %v746_v40 = vpop.f32.mrf.mxu2  ;;  %v796_v42 = vrot.slane %v786_v36, 2  ;;  %v797_v43 = vrot.slane %v786_v36, 4  ;;  %v798_v38 = vrot.slane %v786_v36, 6  ;;  %821 = vst [vmem:[#allocation3 + $0x8] sm:$0x3] %v786_v36  ;;  %v2054_v44 = vmax.f32 %v834_v41, %v836_v39 }
 0x174   :  { %v775_v45 = vpop.f32.mrf.mxu3  ;;  %v891_v1 = vld [vmem:[#allocation3 + $0x2] sm:$0x1]  ;;  %v893_v2 = vld [vmem:[#allocation3 + $0x3] sm:$0x1] }
 0x175   :  { %822 = vst [vmem:[#allocation3 + $0xa] sm:$0x3] %v796_v42  ;;  %v776_v47 = vadd.f32 %v775_v45, %v746_v40  ;;  %842 = vrot.lane.b32.xlu2 %v2054_v44, %s1518_s4  ;;  %v944_v48 = vld [vmem:[#allocation3 + $0x4] sm:$0x1]  ;;  %v946_v49 = vld [vmem:[#allocation3 + $0x5] sm:$0x1]  ;;  %v2067_v51 = vmax.f32 %v891_v1, %v893_v2 }
 0x176   :  { %823 = vst [vmem:[#allocation3 + $0xc] sm:$0x3] %v797_v43  ;;  %v997_v53 = vld [vmem:[#allocation3 + $0x6] sm:$0x1]  ;;  %v999_v54 = vld [vmem:[#allocation3 + $0x7] sm:$0x1]  ;;  %v2058_v57 = vmax.f32 %v944_v48, %v946_v49 }
 0x177   :  { %824 = vst [vmem:[#allocation3 + $0xe] sm:$0x3] %v798_v38  ;;  %v783_v59 = vadd.f32 %v776_v47, %v653_v46  ;;  %v2060_v60 = vmax.f32 %v997_v53, %v999_v54  ;;  %v1428_v49 = vld [vmem:[%s2378_s5 + $0x78] sm:$0xff]  ;;  %v1426_v54 = vld [vmem:[%s2378_s5 + $0x68] sm:$0xff]  ;;  %v1443_v1 = vld [vmem:[%s2378_s5 + $0xe0] sm:$0xff] }
 0x178   :  { %952 = vrot.lane.b32.xlu1 %v2058_v57, %s1518_s4  ;;  %v1446_v53 = vld [vmem:[%s2378_s5 + $0xf8] sm:$0xff]  ;;  %930 = vmatpush.msrb.mxu1 %v1428_v49  ;;  %v856_v2 = vld [vmem:[%s2378_s5 + $0x30] sm:$0xff] }
 0x179   :  { %v787_v63 = vmax.f32 %v783_v59, 0.0  ;;  %1005 = vrot.lane.b32.xlu0 %v2060_v60, %s1518_s4  ;;  %1036 = vmatpush.msrb.mxu3 %v1446_v53  ;;  %v1425_v59 = vld [vmem:[%s2378_s5 + $0x60] sm:$0xff]  ;;  %v1454_v49 = vld [vmem:[%s2378_s5 + $0x130] sm:$0xff] }
 0x17a   :  { %v1050_v30 = vld [vmem:[#allocation3 + $0x8] sm:$0x1]  ;;  %v1052_v31 = vld [vmem:[#allocation3 + $0x9] sm:$0x1]  ;;  %931 = vmatpush.msrb.mxu1 %v1427_v52  ;;  %875 = vmatpush.msrb.mxu0 %v856_v2  ;;  %v1468_v52 = vld [vmem:[%s2378_s5 + $0x190] sm:$0xff] }
 0x17b   :  { %v749_v0 = vpop.f32.mrf.mxu2  ;;  %v799_v4 = vrot.slane %v787_v63, 2  ;;  %v800_v5 = vrot.slane %v787_v63, 4  ;;  %v801_v6 = vrot.slane %v787_v63, 6  ;;  %825 = vst [vmem:[#allocation3 + $0x10] sm:$0x3] %v787_v63  ;;  %v2095_v32 = vmax.f32 %v1050_v30, %v1052_v31  ;;  %1037 = vmatpush.msrb.mxu3 %v1445_v58  ;;  %v1424_v63 = vld [vmem:[%s2378_s5 + $0x58] sm:$0xff] }
 0x17c   :  { %v778_v50 = vpop.f32.mrf.mxu3  ;;  %v1103_v46 = vld [vmem:[#allocation3 + $0xa] sm:$0x1]  ;;  %v1105_v47 = vld [vmem:[#allocation3 + $0xb] sm:$0x1]  ;;  %932 = vmatpush.msrb.mxu1 %v1426_v54  ;;  %v1473_v30 = vld [vmem:[%s2378_s5 + $0x1b8] sm:$0xff] }
 0x17d   :  { %826 = vst [vmem:[#allocation3 + $0x12] sm:$0x3] %v799_v4  ;;  %v779_v7 = vadd.f32 %v778_v50, %v749_v0  ;;  %v1156_v24 = vld [vmem:[#allocation3 + $0xc] sm:$0x1]  ;;  %v1158_v25 = vld [vmem:[#allocation3 + $0xd] sm:$0x1]  ;;  %v2115_v48 = vmax.f32 %v1103_v46, %v1105_v47  ;;  %1038 = vmatpush.msrb.mxu3 %v1444_v61 }
 0x17e   :  { %827 = vst [vmem:[#allocation3 + $0x14] sm:$0x3] %v800_v5  ;;  %v2089_v29 = vmax.f32 %v1156_v24, %v1158_v25  ;;  %v1209_v43 = vld [vmem:[#allocation3 + $0xe] sm:$0x1]  ;;  %v1211_v38 = vld [vmem:[#allocation3 + $0xf] sm:$0x1]  ;;  %933 = vmatpush.msrb.mxu1 %v1425_v59 }
 0x17f   :  { %828 = vst [vmem:[#allocation3 + $0x16] sm:$0x3] %v801_v6  ;;  %v784_v56 = vadd.f32 %v779_v7, %v654_v55  ;;  %v2111_v45 = vmax.f32 %v1209_v43, %v1211_v38  ;;  %v1437_v0 = vld [vmem:[%s2378_s5 + $0xb8] sm:$0xff]  ;;  %v1436_v4 = vld [vmem:[%s2378_s5 + $0xb0] sm:$0xff]  ;;  %1039 = vmatpush.msrb.mxu3 %v1443_v1  ;;  %v855_v6 = vld [vmem:[%s2378_s5 + $0x28] sm:$0xff] }
 0x180   :  { %899 = vrot.lane.b32.xlu1 %v2067_v51, %s1518_s4  ;;  %983 = vmatpush.msrb.mxu2 %v1437_v0  ;;  %v1442_v5 = vld [vmem:[%s2378_s5 + $0xd8] sm:$0xff]  ;;  %v1422_v50 = vld [vmem:[%s2378_s5 + $0x48] sm:$0xff]  ;;  %v1441_v7 = vld [vmem:[%s2378_s5 + $0xd0] sm:$0xff] }
 0x181   :  { %v788_v8 = vmax.f32 %v784_v56, 0.0  ;;  %934 = vmatpush.msrb.mxu1 %v1424_v63  ;;  %1040 = vmatpush.msrb.mxu3 %v1442_v5  ;;  %v1435_v55 = vld [vmem:[%s2378_s5 + $0xa8] sm:$0xff]  ;;  %v854_v56 = vld [vmem:[%s2378_s5 + $0x20] sm:$0xff]  ;;  %v1455_v38 = vld [vmem:[%s2378_s5 + $0x138] sm:$0xff] }
 0x182   :  { %v835_v9 = vld [vmem:[#allocation3 + $0x10] sm:$0x1]  ;;  %v837_v11 = vld [vmem:[#allocation3 + $0x11] sm:$0x1]  ;;  %984 = vmatpush.msrb.mxu2 %v1436_v4  ;;  %876 = vmatpush.msrb.mxu0 %v855_v6  ;;  %v1431_v24 = vld [vmem:[%s2378_s5 + $0x88] sm:$0xff] }
 0x183   :  { %v802_v10 = vrot.slane %v788_v8, 2  ;;  %v803_v12 = vrot.slane %v788_v8, 4  ;;  %v804_v13 = vrot.slane %v788_v8, 6  ;;  %829 = vst [vmem:[#allocation3 + $0x18] sm:$0x3] %v788_v8  ;;  %v2071_v14 = vmax.f32 %v835_v9, %v837_v11  ;;  %935 = vmatpush.msrb.mxu1 %v1423_v3  ;;  %1041 = vmatpush.msrb.mxu3 %v1441_v7  ;;  %v1421_v8 = vld [vmem:[%s2378_s5 + $0x40] sm:$0xff] }
 0x184   :  { %v892_v15 = vld [vmem:[#allocation3 + $0x12] sm:$0x1]  ;;  %v894_v16 = vld [vmem:[#allocation3 + $0x13] sm:$0x1]  ;;  %985 = vmatpush.msrb.mxu2 %v1435_v55  ;;  %877 = vmatpush.msrb.mxu0 %v854_v56  ;;  %v1434_v9 = vld [vmem:[%s2378_s5 + $0xa0] sm:$0xff] }
 0x185   :  { %830 = vst [vmem:[#allocation3 + $0x1a] sm:$0x3] %v802_v10  ;;  %844 = vrot.lane.b32.xlu0 %v2071_v14, %s1518_s4  ;;  %v2075_v17 = vmax.f32 %v892_v15, %v894_v16  ;;  %v945_v21 = vld [vmem:[#allocation3 + $0x14] sm:$0x1]  ;;  %v947_v22 = vld [vmem:[#allocation3 + $0x15] sm:$0x1]  ;;  %936 = vmatpush.msrb.mxu1 %v1422_v50 }
 0x186   :  { %831 = vst [vmem:[#allocation3 + $0x1c] sm:$0x3] %v803_v12  ;;  %v998_v18 = vld [vmem:[#allocation3 + $0x16] sm:$0x1]  ;;  %v1000_v19 = vld [vmem:[#allocation3 + $0x17] sm:$0x1]  ;;  %v2083_v23 = vmax.f32 %v945_v21, %v947_v22  ;;  %986 = vmatpush.msrb.mxu2 %v1434_v9 }
 0x187   :  { %832 = vst [vmem:[#allocation3 + $0x1e] sm:$0x3] %v804_v13  ;;  %v2077_v20 = vmax.f32 %v998_v18, %v1000_v19  ;;  %901 = vrot.lane.b32.xlu2 %v2075_v17, %s1518_s4  ;;  %937 = vmatpush.msrb.mxu1 %v1421_v8  ;;  %v1440_v11 = vld [vmem:[%s2378_s5 + $0xc8] sm:$0xff]  ;;  %v853_v10 = vld [vmem:[%s2378_s5 + $0x18] sm:$0xff]  ;;  %v1439_v13 = vld [vmem:[%s2378_s5 + $0xc0] sm:$0xff] }
 0x188   :  { %1042 = vmatpush.msrb.mxu3 %v1440_v11  ;;  %v1433_v12 = vld [vmem:[%s2378_s5 + $0x98] sm:$0xff]  ;;  %878 = vmatpush.msrb.mxu0 %v853_v10  ;;  %v852_v15 = vld [vmem:[%s2378_s5 + $0x10] sm:$0xff]  ;;  %v851_v21 = vld [vmem:[%s2378_s5 + $0x8] sm:$0xff] }
 0x189   :  { %1007 = vrot.lane.b32.xlu1 %v2077_v20, %s1518_s4  ;;  %987 = vmatpush.msrb.mxu2 %v1433_v12  ;;  %v1482_v16 = vld [vmem:[%s2378_s5 + $0x1f8] sm:$0xff]  ;;  %v1432_v18 = vld [vmem:[%s2378_s5 + $0x90] sm:$0xff]  ;;  %v850_v25 = vld [vmem:[%s2378_s5] sm:$0xff] }
 0x18a   :  { %v1051_v41 = vld [vmem:[#allocation3 + $0x18] sm:$0x1]  ;;  %v1053_v39 = vld [vmem:[#allocation3 + $0x19] sm:$0x1]  ;;  %1043 = vmatpush.msrb.mxu3 %v1439_v13  ;;  %879 = vmatpush.msrb.mxu0 %v852_v15  ;;  %v1481_v22 = vld [vmem:[%s2378_s5 + $0x1f0] sm:$0xff] }
 0x18b   :  { %v2107_v42 = vmax.f32 %v1051_v41, %v1053_v39  ;;  %988 = vmatpush.msrb.mxu2 %v1432_v18  ;;  %v1479_v31 = vld [vmem:[%s2378_s5 + $0x1e0] sm:$0xff]  ;;  %v1477_v41 = vld [vmem:[%s2378_s5 + $0x1d0] sm:$0xff]  ;;  %v1476_v43 = vld [vmem:[%s2378_s5 + $0x1c8] sm:$0xff]  ;;  %1142 = vmatpush.msra.mxu1 %v1464_v62 }
 0x18c   :  { %v1104_v35 = vld [vmem:[#allocation3 + $0x1a] sm:$0x1]  ;;  %v1106_v36 = vld [vmem:[#allocation3 + $0x1b] sm:$0x1]  ;;  %1248 = vmatpush.msra.mxu3 %v1482_v16  ;;  %880 = vmatpush.msrb.mxu0 %v851_v21  ;;  %v1470_v39 = vld [vmem:[%s2378_s5 + $0x1a0] sm:$0xff] }
 0x18d   :  { %954 = vrot.lane.b32.xlu0 %v2083_v23, %s1518_s4  ;;  %v1157_v26 = vld [vmem:[#allocation3 + $0x1c] sm:$0x1]  ;;  %v1159_v27 = vld [vmem:[#allocation3 + $0x1d] sm:$0x1]  ;;  %v2101_v40 = vmax.f32 %v1104_v35, %v1106_v36  ;;  %989 = vmatpush.msrb.mxu2 %v1431_v24  ;;  %v1471_v36 = vld [vmem:[%s2378_s5 + $0x1a8] sm:$0xff] }
 0x18e   :  { %v2087_v28 = vmax.f32 %v1157_v26, %v1159_v27  ;;  %v1210_v33 = vld [vmem:[#allocation3 + $0x1e] sm:$0x1]  ;;  %v1212_v34 = vld [vmem:[#allocation3 + $0x1f] sm:$0x1]  ;;  %1249 = vmatpush.msra.mxu3 %v1481_v22  ;;  %v1480_v26 = vld [vmem:[%s2378_s5 + $0x1e8] sm:$0xff]  ;;  %881 = vmatpush.msrb.mxu0 %v850_v25 }
 0x18f   :  { %v2099_v37 = vmax.f32 %v1210_v33, %v1212_v34  ;;  %v1430_v27 = vld [vmem:[%s2378_s5 + $0x80] sm:$0xff]  ;;  %v1472_v33 = vld [vmem:[%s2378_s5 + $0x1b0] sm:$0xff]  ;;  %v1478_v34 = vld [vmem:[%s2378_s5 + $0x1d8] sm:$0xff] }
 0x190   :  { %1166 = vrot.lane.b32.xlu2 %v2087_v28, %s1518_s4  ;;  %1250 = vmatpush.msra.mxu3 %v1480_v26  ;;  %v1469_v46 = vld [vmem:[%s2378_s5 + $0x198] sm:$0xff]  ;;  %v1475_v47 = vld [vmem:[%s2378_s5 + $0x1c0] sm:$0xff]  ;;  %v1453_v54 = vld [vmem:[%s2378_s5 + $0x128] sm:$0xff] }
 0x191   :  { %1164 = vrot.lane.b32.xlu1 %v2089_v29, %s1518_s4  ;;  %990 = vmatpush.msrb.mxu2 %v1430_v27  ;;  %v1467_v58 = vld [vmem:[%s2378_s5 + $0x188] sm:$0xff]  ;;  %v1452_v61 = vld [vmem:[%s2378_s5 + $0x120] sm:$0xff]  ;;  %v1451_v0 = vld [vmem:[%s2378_s5 + $0x118] sm:$0xff] }
 0x192   :  { %1251 = vmatpush.msra.mxu3 %v1479_v31  ;;  %1089 = vmatpush.msra.mxu0 %v1455_v38  ;;  %v1466_v63 = vld [vmem:[%s2378_s5 + $0x180] sm:$0xff]  ;;  %v1463_v1 = vld [vmem:[%s2378_s5 + $0x170] sm:$0xff]  ;;  %v1462_v5 = vld [vmem:[%s2378_s5 + $0x168] sm:$0xff] }
 0x193   :  { %1195 = vmatpush.msra.mxu2 %v1473_v30  ;;  %1143 = vmatpush.msra.mxu1 %v1463_v1  ;;  %v1450_v4 = vld [vmem:[%s2378_s5 + $0x110] sm:$0xff]  ;;  %v1461_v7 = vld [vmem:[%s2378_s5 + $0x160] sm:$0xff]  ;;  %v1460_v8 = vld [vmem:[%s2378_s5 + $0x158] sm:$0xff] }
 0x194   :  { %1252 = vmatpush.msra.mxu3 %v1478_v34  ;;  %1090 = vmatpush.msra.mxu0 %v1454_v49  ;;  %v1448_v56 = vld [vmem:[%s2378_s5 + $0x100] sm:$0xff]  ;;  %v1459_v9 = vld [vmem:[%s2378_s5 + $0x150] sm:$0xff]  ;;  %v1458_v13 = vld [vmem:[%s2378_s5 + $0x148] sm:$0xff] }
 0x195   :  { %1058 = vrot.lane.b32.xlu0 %v2095_v32, %s1518_s4  ;;  %1196 = vmatpush.msra.mxu2 %v1472_v33  ;;  %v1457_v18 = vld [vmem:[%s2378_s5 + $0x140] sm:$0xff] }
 0x196   :  { %1253 = vmatpush.msra.mxu3 %v1477_v41  ;;  %1091 = vmatpush.msra.mxu0 %v1453_v54 }
 0x197   :  { %1197 = vmatpush.msra.mxu2 %v1471_v36  ;;  %1144 = vmatpush.msra.mxu1 %v1462_v5 }
 0x198   :  { %1219 = vrot.lane.b32.xlu2 %v2099_v37, %s1518_s4  ;;  %1254 = vmatpush.msra.mxu3 %v1476_v43 }
 0x199   :  { %1113 = vrot.lane.b32.xlu1 %v2101_v40, %s1518_s4  ;;  %1198 = vmatpush.msra.mxu2 %v1470_v39 }
 0x19a   :  { %1255 = vmatpush.msra.mxu3 %v1475_v47  ;;  %1092 = vmatpush.msra.mxu0 %v1452_v61 }
 0x19b   :  { %1199 = vmatpush.msra.mxu2 %v1469_v46  ;;  %1145 = vmatpush.msra.mxu1 %v1461_v7 }
 0x19c   :  { %1093 = vmatpush.msra.mxu0 %v1451_v0 }
 0x19d   :  { %1060 = vrot.lane.b32.xlu0 %v2107_v42, %s1518_s4  ;;  %1200 = vmatpush.msra.mxu2 %v1468_v52 }
 0x19e   :  { %1094 = vmatpush.msra.mxu0 %v1450_v4  ;;  %1146 = vmatpush.msra.mxu1 %v1460_v8 }
 0x19f   :  { %1201 = vmatpush.msra.mxu2 %v1467_v58  ;;  %v1489_v58 = vld [vmem:[%s2379_s6] ss:$0 sm:$0xff] }
 0x1a0   :  { %1217 = vrot.lane.b32.xlu2 %v2111_v45, %s1518_s4  ;;  %1147 = vmatpush.msra.mxu1 %v1459_v9 }
 0x1a1   :  { %1202 = vmatpush.msra.mxu2 %v1466_v63 }
 0x1a2   :  { %1148 = vmatpush.msra.mxu1 %v1458_v13 }
 0x1a4   :  { %1149 = vmatpush.msra.mxu1 %v1457_v18 }
 0x1a5   :  { %1111 = vrot.lane.b32.xlu0 %v2115_v48, %s1518_s4 }
 0x1cf   :  { %v2206_v19 = vpop.permute.xlu2 %842 }
 0x1d0   :  { %v848_v15 = vmax.f32 %v2054_v44, %v2206_v19 }
 0x1e1   :  { %v902_v35 = vpop.permute.xlu2 %901 }
 0x1e2   :  { %v906_v2 = vmax.f32 %v2075_v17, %v902_v35  ;;  %v1449_v17 = vld [vmem:[%s2378_s5 + $0x108] sm:$0xff] }
 0x1e3   :  { %1095 = vmatpush.msra.mxu0 %v1449_v17 }
 0x1e4   :  { %v918_v50 = vrot.slane %v906_v2, 7 }
 0x1e5   :  { %1096 = vmatpush.msra.mxu0 %v1448_v56 }
 0x1ea   :  { %v2265_v53 = vpop.permute.xlu1 %952  ;;  %v2273_v59 = vpop.permute.xlu2 %1166 }
 0x1eb   :  { %v1006_v3 = vpop.permute.xlu0 %1005  ;;  %v958_v30 = vmax.f32 %v2058_v57, %v2265_v53  ;;  %v1171_v35 = vmax.f32 %v2087_v28, %v2273_v59 }
 0x1ed   :  { %v1183_v57 = vrot.slane %v1171_v35, 7 }
 0x1f2   :  { %v900_v6 = vpop.permute.xlu1 %899  ;;  %v1220_v11 = vpop.permute.xlu2 %1219 }
 0x1f3   :  { %v905_v55 = vmax.f32 %v2067_v51, %v900_v6  ;;  %v1224_v31 = vmax.f32 %v2099_v37, %v1220_v11 }
 0x1f5   :  { %v919_v51 = vsel %vm861_vm8, %v918_v50, %v905_v55 }
 0x1f6   :  { %1429 = vmatmul.msk.f32.vlgmr.msrb.gmra.mxu1 %vm863_vm9, %v919_v51  ;;  %v1490_v51 = vld [vmem:[%s2381_s8] ss:$0 sm:$0xff] }
 0x1f7   :  { %v845_v10 = vpop.permute.xlu0 %844 }
 0x1f8   :  { %v849_v12 = vmax.f32 %v2071_v14, %v845_v10  ;;  %v1011_v14 = vmax.f32 %v2060_v60, %v1006_v3 }
 0x1fa   :  { %v860_v16 = vrot.slane %v849_v12, 7  ;;  %v1218_v27 = vpop.permute.xlu2 %1217 }
 0x1fb   :  { %v1008_v21 = vpop.permute.xlu1 %1007  ;;  %v1223_v33 = vmax.f32 %v2111_v45, %v1218_v27 }
 0x1fc   :  { %v862_v22 = vsel %vm861_vm8, %v860_v16, %v848_v15  ;;  %v1012_v24 = vmax.f32 %v2077_v20, %v1008_v21 }
 0x1fd   :  { %1420 = vmatmul.msk.f32.vlgmr.msrb.gmra.mxu0 %vm863_vm9, %v862_v22 }
 0x1fe   :  { %v1024_v25 = vrot.slane %v1012_v24, 7 }
 0x1ff   :  { %v955_v26 = vpop.permute.xlu0 %954 }
 0x200   :  { %v1025_v44 = vsel %vm861_vm8, %v1024_v25, %v1011_v14  ;;  %v959_v19 = vmax.f32 %v2083_v23, %v955_v26  ;;  %v1236_v23 = vrot.slane %v1224_v31, 7 }
 0x201   :  { %1447 = vmatmul.msk.f32.vlgmr.msrb.gmra.mxu3 %vm863_vm9, %v1025_v44 }
 0x202   :  { %v971_v20 = vrot.slane %v959_v19, 7  ;;  %v1237_v41 = vsel %vm861_vm8, %v1236_v23, %v1223_v33 }
 0x203   :  { %v1165_v60 = vpop.permute.xlu1 %1164 }
 0x204   :  { %v972_v34 = vsel %vm861_vm8, %v971_v20, %v958_v30  ;;  %v1170_v39 = vmax.f32 %v2089_v29, %v1165_v60 }
 0x205   :  { %1438 = vmatmul.msk.f32.vlgmr.msrb.gmra.mxu2 %vm863_vm9, %v972_v34 }
 0x206   :  { %v1184_v37 = vsel %vm861_vm8, %v1183_v57, %v1170_v39 }
 0x207   :  { %v1059_v36 = vpop.permute.xlu0 %1058 }
 0x208   :  { %v1064_v46 = vmax.f32 %v2095_v32, %v1059_v36  ;;  %v1264_v32 = vld [vmem:[%s2380_s7 + $0x10] sm:$0xff] }
 0x209   :  { %1483 = vmatmul.msk.f32.vlgmr.msra.gmra.mxu3 %vm863_vm9, %v1237_v41 }
 0x20b   :  { %v1114_v38 = vpop.permute.xlu1 %1113 }
 0x20c   :  { %v1118_v47 = vmax.f32 %v2101_v40, %v1114_v38  ;;  %v1263_v40 = vld [vmem:[%s2380_s7 + $0x8] sm:$0xff] }
 0x20d   :  { %1474 = vmatmul.msk.f32.vlgmr.msra.gmra.mxu2 %vm863_vm9, %v1184_v37 }
 0x20e   :  { %v1130_v52 = vrot.slane %v1118_v47, 7 }
 0x20f   :  { %v1061_v45 = vpop.permute.xlu0 %1060 }
 0x210   :  { %v1065_v43 = vmax.f32 %v2107_v42, %v1061_v45  ;;  %v1265_v42 = vld [vmem:[%s2380_s7 + $0x18] sm:$0xff] }
 0x211   :  { %1286 = vmatpush.msrb.mxu0 %v1265_v42 }
 0x212   :  { %v1077_v28 = vrot.slane %v1065_v43, 7 }
 0x213   :  { %1287 = vmatpush.msrb.mxu0 %v1264_v32 }
 0x214   :  { %v1078_v49 = vsel %vm861_vm8, %v1077_v28, %v1064_v46 }
 0x215   :  { %1456 = vmatmul.msk.f32.vlgmr.msra.gmra.mxu0 %vm863_vm9, %v1078_v49 }
 0x216   :  { %1288 = vmatpush.msrb.mxu0 %v1263_v40 }
 0x217   :  { %v1112_v29 = vpop.permute.xlu0 %1111 }
 0x218   :  { %v1117_v53 = vmax.f32 %v2115_v48, %v1112_v29  ;;  %v1262_v48 = vld [vmem:[%s2380_s7] sm:$0xff] }
 0x219   :  { %1289 = vmatpush.msrb.mxu0 %v1262_v48 }
 0x21a   :  { %v1131_v54 = vsel %vm861_vm8, %v1130_v52, %v1117_v53 }
 0x21b   :  { %1465 = vmatmul.msk.f32.vlgmr.msra.gmra.mxu1 %vm863_vm9, %v1131_v54 }
 0x273   :  { %v939_v62 = vpop.f32.mrf.mxu1 }
 0x27a   :  { %v883_v59 = vpop.f32.mrf.mxu0 }
 0x27b   :  { %v889_v61 = vadd.f32 %v1489_v58, %v883_v59 }
 0x27d   :  { %v942_v0 = vadd.f32 %v939_v62, %v889_v61 }
 0x284   :  { %v1045_v2 = vpop.f32.mrf.mxu3 }
 0x288   :  { %v992_v63 = vpop.f32.mrf.mxu2 }
 0x289   :  { %v995_v1 = vadd.f32 %v992_v63, %v942_v0 }
 0x28b   :  { %v1048_v4 = vadd.f32 %v1045_v2, %v995_v1 }
 0x28c   :  { %v1257_v7 = vpop.f32.mrf.mxu3 }
 0x290   :  { %v1204_v55 = vpop.f32.mrf.mxu2 }
 0x292   :  { %v1098_v3 = vpop.f32.mrf.mxu0 }
 0x293   :  { %v1101_v5 = vadd.f32 %v1098_v3, %v1048_v4 }
 0x298   :  { %v1151_v6 = vpop.f32.mrf.mxu1 }
 0x299   :  { %v1154_v50 = vadd.f32 %v1151_v6, %v1101_v5 }
 0x29b   :  { %v1207_v17 = vadd.f32 %v1204_v55, %v1154_v50 }
 0x29d   :  { %v1260_v56 = vadd.f32 %v1257_v7, %v1207_v17 }
 0x29f   :  { %v1261_v8 = vmax.f32 %v1260_v56, 0.0 }
 0x2a1   :  { %1484 = vmatmul.msk.f32.vlgmr.msrb.gmra.mxu0 %vm1270_vm10, %v1261_v8 }
 0x31e   :  { %v1291_v9 = vpop.f32.mrf.mxu0 }
 0x31f   :  { %v1292_v11 = vadd.f32 %v1490_v51, %v1291_v9 }
 0x321   :  { %1295 = vst.msk [vmem:[#allocation4] sm:$0x3] %vm1294_vm11, %v1292_v11 }
 0x322   :  { %1306 = dma.vmem_to_hbm [thread:$0]  %s1302_s16, 32, %s1304_s19, [#allocation5]  }
 0x323   :  { %1515 = dma.done.wait [#allocation5], 32  }
 0x324   :  { %1516 = vsyncadd [#allocation5], 4294967264 }
 0x325   :  { %1311 = vsyncpa [#allocation5], 1 }

</bundles_post_ra>
